<compile_context>
chip_gen: v7x
topology: tpu7x:2x2x1
jax: 0.10.0
libtpu: 0.0.40
codegen_flags: <defaults>
</compile_context>

<pallas_src>
import jax
import jax.numpy as jnp
from jax.experimental import pallas as pl
from jax.experimental.pallas import tpu as pltpu

EPS = 1e-5


def _u_down_kernel(x_ref, w1_ref, g1_ref, b1_ref, w2_ref, g2_ref, b2_ref,
                   o_ref, pad_ref):
    N, H, W, Cin = x_ref.shape
    Hp, Wp = H // 2, W // 2
    Cout = o_ref.shape[-1]
    M = N * Hp * Wp

    # ---------------- MaxPool2d(kernel_size=2, stride=2) ----------------
    # W (sublane axis) pooling via two strided loads from the ref; H pooling via
    # an outer-dim reshape + max (no minor-dim relayout).
    x_we = x_ref[:, :, pl.ds(0, Wp, 2), :]            # (N, H, Wp, Cin)
    x_wo = x_ref[:, :, pl.ds(1, Wp, 2), :]
    xw = jnp.maximum(x_we, x_wo)
    xp = jnp.max(xw.reshape(N, Hp, 2, Wp, Cin), axis=2)   # (N, Hp, Wp, Cin)

    # Shared padded scratch: zero once; the halo stays zero for both convs and
    # only the interior is overwritten per conv.
    pad_ref[...] = jnp.zeros(pad_ref.shape, pad_ref.dtype)

    def conv3x3_bn_relu(act, w_ref, g_ref, b_ref, c_in):
        # act: (N, Hp, Wp, c_in) f32 ; w_ref: (9*c_in, Cout)
        pad_ref[:, 1:Hp + 1, 1:Wp + 1, :c_in] = act
        # im2col: 9 shifted taps concatenated along the channel/lane axis.
        taps = [pad_ref[:, dy:dy + Hp, dx:dx + Wp, :c_in]
                for dy in range(3) for dx in range(3)]
        patches = jnp.concatenate(taps, axis=-1).reshape(M, 9 * c_in)
        # Single MXU matmul per conv, default precision (1 bf16 pass, f32 acc).
        acc = jnp.dot(patches, w_ref[...], preferred_element_type=jnp.float32)
        # Training-mode BatchNorm (biased variance) with folded scale/shift, ReLU.
        mean = jnp.mean(acc, axis=0, keepdims=True)
        cen = acc - mean
        var = jnp.mean(cen * cen, axis=0, keepdims=True)
        scale = g_ref[...] * jax.lax.rsqrt(var + EPS)     # (1, Cout)
        shift = b_ref[...] - mean * scale
        return jnp.maximum(acc * scale + shift, 0.0)      # (M, Cout)

    y1 = conv3x3_bn_relu(xp, w1_ref, g1_ref, b1_ref, Cin)
    y2 = conv3x3_bn_relu(y1.reshape(N, Hp, Wp, Cout), w2_ref, g2_ref, b2_ref,
                         Cout)

    o_ref[...] = y2.astype(o_ref.dtype)                   # (M, Cout)


def u_down(x_nchw, w1, g1, b1, w2, g2, b2):
    """x_nchw: (N, Cin, H, W) f32; w1/w2 HWIO; gamma/beta per out-channel."""
    N, Cin, H, W = x_nchw.shape
    Cout = w1.shape[-1]
    Hp, Wp = H // 2, W // 2
    Cmax = max(Cin, Cout)

    x_nhwc = jnp.transpose(x_nchw, (0, 2, 3, 1)).astype(jnp.float32)
    # Host-side im2col weight layout: HWIO (3,3,C,Cout) -> (9*C, Cout); the
    # row-major flatten matches the kernel's (dy, dx, channel) tap order.
    w1_r = w1.astype(jnp.float32).reshape(9 * Cin, Cout)
    w2_r = w2.astype(jnp.float32).reshape(9 * Cout, Cout)

    out_flat = pl.pallas_call(
        _u_down_kernel,
        out_shape=jax.ShapeDtypeStruct((N * Hp * Wp, Cout), jnp.float32),
        in_specs=[pl.BlockSpec(memory_space=pltpu.MemorySpace.VMEM)] * 7,
        out_specs=pl.BlockSpec(memory_space=pltpu.MemorySpace.VMEM),
        scratch_shapes=[
            # one shared zero-padded activation buffer for both convs
            pltpu.VMEM((N, Hp + 2, Wp + 2, Cmax), jnp.float32),
        ],
    )(x_nhwc, w1_r,
      g1.reshape(1, -1).astype(jnp.float32),
      b1.reshape(1, -1).astype(jnp.float32),
      w2_r,
      g2.reshape(1, -1).astype(jnp.float32),
      b2.reshape(1, -1).astype(jnp.float32))

    out_nhwc = out_flat.reshape(N, Hp, Wp, Cout)
    return jnp.transpose(out_nhwc, (0, 3, 1, 2))           # NCHW


def reference(x, w1, g1, b1, w2, g2, b2):
    """Pure-JAX (XLA) reference in NCHW, mirrors the PyTorch forward."""
    xp = jax.lax.reduce_window(x, -jnp.inf, jax.lax.max,
                               (1, 1, 2, 2), (1, 1, 2, 2), 'VALID')

    def conv_bn_relu(h, w_hwio, g, b):
        w_oihw = jnp.transpose(w_hwio, (3, 2, 0, 1))
        y = jax.lax.conv_general_dilated(
            h, w_oihw, (1, 1), 'SAME',
            dimension_numbers=('NCHW', 'OIHW', 'NCHW'),
            precision=jax.lax.Precision.HIGHEST)
        mean = jnp.mean(y, axis=(0, 2, 3), keepdims=True)
        var = jnp.mean((y - mean) ** 2, axis=(0, 2, 3), keepdims=True)
        y = (y - mean) * jax.lax.rsqrt(var + EPS)
        y = y * g.reshape(1, -1, 1, 1) + b.reshape(1, -1, 1, 1)
        return jnp.maximum(y, 0.0)

    h = conv_bn_relu(xp, w1, g1, b1)
    h = conv_bn_relu(h, w2, g2, b2)
    return h


if __name__ == "__main__":
    N, Cin, Cout, H, W = 2, 4, 8, 16, 16
    ks = jax.random.split(jax.random.PRNGKey(0), 6)

    x = jax.random.normal(ks[0], (N, Cin, H, W), jnp.float32)
    # deterministic synthetic parameters (shapes as in the module __init__)
    w1 = 0.1 * jax.random.normal(ks[1], (3, 3, Cin, Cout), jnp.float32)   # HWIO
    w2 = 0.1 * jax.random.normal(ks[2], (3, 3, Cout, Cout), jnp.float32)  # HWIO
    g1 = 1.0 + 0.1 * jax.random.normal(ks[3], (Cout,), jnp.float32)
    b1 = 0.1 * jax.random.normal(ks[4], (Cout,), jnp.float32)
    g2 = 1.0 + 0.1 * jax.random.normal(ks[5], (Cout,), jnp.float32)
    b2 = jnp.zeros((Cout,), jnp.float32)

    out = jax.block_until_ready(u_down(x, w1, g1, b1, w2, g2, b2))
    ref = jax.block_until_ready(reference(x, w1, g1, b1, w2, g2, b2))

    assert out.shape == (N, Cout, H // 2, W // 2), out.shape
    assert jnp.allclose(out, ref, atol=1e-2, rtol=1e-2), \
        float(jnp.max(jnp.abs(out - ref)))
    print("KERNEL_OK")
</pallas_src>

<mosaic_0001>
module attributes {stable_mosaic.version = 11 : i64} {
  func.func @_u_down_kernel(%arg0: memref<2x16x16x4xf32, #tpu.memory_space<vmem>>, %arg1: memref<36x8xf32, #tpu.memory_space<vmem>>, %arg2: memref<1x8xf32, #tpu.memory_space<vmem>>, %arg3: memref<1x8xf32, #tpu.memory_space<vmem>>, %arg4: memref<72x8xf32, #tpu.memory_space<vmem>>, %arg5: memref<1x8xf32, #tpu.memory_space<vmem>>, %arg6: memref<1x8xf32, #tpu.memory_space<vmem>>, %arg7: memref<128x8xf32, #tpu.memory_space<vmem>>, %arg8: memref<2x10x10x8xf32, #tpu.memory_space<vmem>>) attributes {dimension_semantics = [], scalar_prefetch = 0 : i64, scratch_operands = 1 : i64, tpu.core_type = #tpu.core_type<tc>} {
    %c0 = arith.constant 0 : index
    %c0_0 = arith.constant 0 : index
    %c0_1 = arith.constant 0 : index
    %c0_2 = arith.constant 0 : index
    %0 = tpu.strided_load %arg0[%c0, %c0_0, %c0_1, %c0_2] {strides = array<i32: 1, 1, 2, 1>} : memref<2x16x16x4xf32, #tpu.memory_space<vmem>>, vector<2x16x8x4xf32>
    %c0_3 = arith.constant 0 : index
    %c0_4 = arith.constant 0 : index
    %c1 = arith.constant 1 : index
    %c0_5 = arith.constant 0 : index
    %1 = tpu.strided_load %arg0[%c0_3, %c0_4, %c1, %c0_5] {strides = array<i32: 1, 1, 2, 1>} : memref<2x16x16x4xf32, #tpu.memory_space<vmem>>, vector<2x16x8x4xf32>
    %2 = arith.maximumf %0, %1 : vector<2x16x8x4xf32>
    %3 = vector.shape_cast %2 : vector<2x16x8x4xf32> to vector<2x8x2x8x4xf32>
    %cst = arith.constant dense<0xFF800000> : vector<2x8x8x4xf32>
    %4 = vector.multi_reduction <maximumf>, %3, %cst [2] : vector<2x8x2x8x4xf32> to vector<2x8x8x4xf32>
    %cst_6 = arith.constant 0.000000e+00 : f32
    %5 = vector.broadcast %cst_6 : f32 to vector<2x10x10x8xf32>
    %c0_7 = arith.constant 0 : index
    %c0_8 = arith.constant 0 : index
    %c0_9 = arith.constant 0 : index
    %c0_10 = arith.constant 0 : index
    %6 = vector.load %arg8[%c0_7, %c0_8, %c0_9, %c0_10] : memref<2x10x10x8xf32, #tpu.memory_space<vmem>>, vector<2x10x10x8xf32>
    tpu.vector_store %arg8[%c0_7, %c0_8, %c0_9, %c0_10], %5 {strides = array<i32>} : memref<2x10x10x8xf32, #tpu.memory_space<vmem>>, vector<2x10x10x8xf32>,
    %c0_11 = arith.constant 0 : index
    %c1_12 = arith.constant 1 : index
    %c1_13 = arith.constant 1 : index
    %c0_14 = arith.constant 0 : index
    %7 = vector.load %arg8[%c0_11, %c1_12, %c1_13, %c0_14] : memref<2x10x10x8xf32, #tpu.memory_space<vmem>>, vector<2x8x8x4xf32>
    tpu.vector_store %arg8[%c0_11, %c1_12, %c1_13, %c0_14], %4 {strides = array<i32>} : memref<2x10x10x8xf32, #tpu.memory_space<vmem>>, vector<2x8x8x4xf32>,
    %c0_15 = arith.constant 0 : index
    %c0_16 = arith.constant 0 : index
    %c0_17 = arith.constant 0 : index
    %c0_18 = arith.constant 0 : index
    %8 = vector.load %arg8[%c0_15, %c0_16, %c0_17, %c0_18] : memref<2x10x10x8xf32, #tpu.memory_space<vmem>>, vector<2x8x8x4xf32>
    %c0_19 = arith.constant 0 : index
    %c0_20 = arith.constant 0 : index
    %c1_21 = arith.constant 1 : index
    %c0_22 = arith.constant 0 : index
    %9 = vector.load %arg8[%c0_19, %c0_20, %c1_21, %c0_22] : memref<2x10x10x8xf32, #tpu.memory_space<vmem>>, vector<2x8x8x4xf32>
    %c0_23 = arith.constant 0 : index
    %c0_24 = arith.constant 0 : index
    %c2 = arith.constant 2 : index
    %c0_25 = arith.constant 0 : index
    %10 = vector.load %arg8[%c0_23, %c0_24, %c2, %c0_25] : memref<2x10x10x8xf32, #tpu.memory_space<vmem>>, vector<2x8x8x4xf32>
    %c0_26 = arith.constant 0 : index
    %c1_27 = arith.constant 1 : index
    %c0_28 = arith.constant 0 : index
    %c0_29 = arith.constant 0 : index
    %11 = vector.load %arg8[%c0_26, %c1_27, %c0_28, %c0_29] : memref<2x10x10x8xf32, #tpu.memory_space<vmem>>, vector<2x8x8x4xf32>
    %c0_30 = arith.constant 0 : index
    %c1_31 = arith.constant 1 : index
    %c1_32 = arith.constant 1 : index
    %c0_33 = arith.constant 0 : index
    %12 = vector.load %arg8[%c0_30, %c1_31, %c1_32, %c0_33] : memref<2x10x10x8xf32, #tpu.memory_space<vmem>>, vector<2x8x8x4xf32>
    %c0_34 = arith.constant 0 : index
    %c1_35 = arith.constant 1 : index
    %c2_36 = arith.constant 2 : index
    %c0_37 = arith.constant 0 : index
    %13 = vector.load %arg8[%c0_34, %c1_35, %c2_36, %c0_37] : memref<2x10x10x8xf32, #tpu.memory_space<vmem>>, vector<2x8x8x4xf32>
    %c0_38 = arith.constant 0 : index
    %c2_39 = arith.constant 2 : index
    %c0_40 = arith.constant 0 : index
    %c0_41 = arith.constant 0 : index
    %14 = vector.load %arg8[%c0_38, %c2_39, %c0_40, %c0_41] : memref<2x10x10x8xf32, #tpu.memory_space<vmem>>, vector<2x8x8x4xf32>
    %c0_42 = arith.constant 0 : index
    %c2_43 = arith.constant 2 : index
    %c1_44 = arith.constant 1 : index
    %c0_45 = arith.constant 0 : index
    %15 = vector.load %arg8[%c0_42, %c2_43, %c1_44, %c0_45] : memref<2x10x10x8xf32, #tpu.memory_space<vmem>>, vector<2x8x8x4xf32>
    %c0_46 = arith.constant 0 : index
    %c2_47 = arith.constant 2 : index
    %c2_48 = arith.constant 2 : index
    %c0_49 = arith.constant 0 : index
    %16 = vector.load %arg8[%c0_46, %c2_47, %c2_48, %c0_49] : memref<2x10x10x8xf32, #tpu.memory_space<vmem>>, vector<2x8x8x4xf32>
    %17 = tpu.concatenate %8, %9, %10, %11, %12, %13, %14, %15, %16 in 3 : vector<2x8x8x4xf32>, vector<2x8x8x4xf32>, vector<2x8x8x4xf32>, vector<2x8x8x4xf32>, vector<2x8x8x4xf32>, vector<2x8x8x4xf32>, vector<2x8x8x4xf32>, vector<2x8x8x4xf32>, vector<2x8x8x4xf32> -> vector<2x8x8x36xf32>
    %18 = vector.shape_cast %17 : vector<2x8x8x36xf32> to vector<128x36xf32>
    %c0_50 = arith.constant 0 : index
    %c0_51 = arith.constant 0 : index
    %19 = vector.load %arg1[%c0_50, %c0_51] : memref<36x8xf32, #tpu.memory_space<vmem>>, vector<36x8xf32>
    %cst_52 = arith.constant dense<0.000000e+00> : vector<128x8xf32>
    %20 = tpu.matmul %18, %19, %cst_52 {dimension_numbers = #tpu.dot_dimension_numbers<[1], [0], [0], [1], [0, 0, 1, 1], [], []>} : vector<128x36xf32>, vector<36x8xf32>, vector<128x8xf32> -> vector<128x8xf32>
    %cst_53 = arith.constant dense<0.000000e+00> : vector<8xf32>
    %21 = vector.multi_reduction <add>, %20, %cst_53 [0] : vector<128x8xf32> to vector<8xf32>
    %22 = vector.shape_cast %21 : vector<8xf32> to vector<1x8xf32>
    %cst_54 = arith.constant 1.280000e+02 : f32
    %23 = vector.broadcast %cst_54 : f32 to vector<1x8xf32>
    %24 = arith.divf %22, %23 : vector<1x8xf32>
    %25 = vector.broadcast %24 : vector<1x8xf32> to vector<128x8xf32>
    %26 = arith.subf %20, %25 : vector<128x8xf32>
    %27 = arith.mulf %26, %26 : vector<128x8xf32>
    %cst_55 = arith.constant dense<0.000000e+00> : vector<8xf32>
    %28 = vector.multi_reduction <add>, %27, %cst_55 [0] : vector<128x8xf32> to vector<8xf32>
    %29 = vector.shape_cast %28 : vector<8xf32> to vector<1x8xf32>
    %cst_56 = arith.constant 1.280000e+02 : f32
    %30 = vector.broadcast %cst_56 : f32 to vector<1x8xf32>
    %31 = arith.divf %29, %30 : vector<1x8xf32>
    %c0_57 = arith.constant 0 : index
    %c0_58 = arith.constant 0 : index
    %32 = vector.load %arg2[%c0_57, %c0_58] : memref<1x8xf32, #tpu.memory_space<vmem>>, vector<1x8xf32>
    %cst_59 = arith.constant 9.99999974E-6 : f32
    %33 = vector.broadcast %cst_59 : f32 to vector<1x8xf32>
    %34 = arith.addf %31, %33 : vector<1x8xf32>
    %35 = math.rsqrt %34 : vector<1x8xf32>
    %36 = arith.mulf %32, %35 : vector<1x8xf32>
    %c0_60 = arith.constant 0 : index
    %c0_61 = arith.constant 0 : index
    %37 = vector.load %arg3[%c0_60, %c0_61] : memref<1x8xf32, #tpu.memory_space<vmem>>, vector<1x8xf32>
    %38 = arith.mulf %24, %36 : vector<1x8xf32>
    %39 = arith.subf %37, %38 : vector<1x8xf32>
    %40 = vector.broadcast %36 : vector<1x8xf32> to vector<128x8xf32>
    %41 = arith.mulf %20, %40 : vector<128x8xf32>
    %42 = vector.broadcast %39 : vector<1x8xf32> to vector<128x8xf32>
    %43 = arith.addf %41, %42 : vector<128x8xf32>
    %cst_62 = arith.constant 0.000000e+00 : f32
    %44 = vector.broadcast %cst_62 : f32 to vector<128x8xf32>
    %45 = arith.maximumf %43, %44 : vector<128x8xf32>
    %46 = vector.shape_cast %45 : vector<128x8xf32> to vector<2x8x8x8xf32>
    %c0_63 = arith.constant 0 : index
    %c1_64 = arith.constant 1 : index
    %c1_65 = arith.constant 1 : index
    %c0_66 = arith.constant 0 : index
    %47 = vector.load %arg8[%c0_63, %c1_64, %c1_65, %c0_66] : memref<2x10x10x8xf32, #tpu.memory_space<vmem>>, vector<2x8x8x8xf32>
    tpu.vector_store %arg8[%c0_63, %c1_64, %c1_65, %c0_66], %46 {strides = array<i32>} : memref<2x10x10x8xf32, #tpu.memory_space<vmem>>, vector<2x8x8x8xf32>,
    %c0_67 = arith.constant 0 : index
    %c0_68 = arith.constant 0 : index
    %c0_69 = arith.constant 0 : index
    %c0_70 = arith.constant 0 : index
    %48 = vector.load %arg8[%c0_67, %c0_68, %c0_69, %c0_70] : memref<2x10x10x8xf32, #tpu.memory_space<vmem>>, vector<2x8x8x8xf32>
    %c0_71 = arith.constant 0 : index
    %c0_72 = arith.constant 0 : index
    %c1_73 = arith.constant 1 : index
    %c0_74 = arith.constant 0 : index
    %49 = vector.load %arg8[%c0_71, %c0_72, %c1_73, %c0_74] : memref<2x10x10x8xf32, #tpu.memory_space<vmem>>, vector<2x8x8x8xf32>
    %c0_75 = arith.constant 0 : index
    %c0_76 = arith.constant 0 : index
    %c2_77 = arith.constant 2 : index
    %c0_78 = arith.constant 0 : index
    %50 = vector.load %arg8[%c0_75, %c0_76, %c2_77, %c0_78] : memref<2x10x10x8xf32, #tpu.memory_space<vmem>>, vector<2x8x8x8xf32>
    %c0_79 = arith.constant 0 : index
    %c1_80 = arith.constant 1 : index
    %c0_81 = arith.constant 0 : index
    %c0_82 = arith.constant 0 : index
    %51 = vector.load %arg8[%c0_79, %c1_80, %c0_81, %c0_82] : memref<2x10x10x8xf32, #tpu.memory_space<vmem>>, vector<2x8x8x8xf32>
    %c0_83 = arith.constant 0 : index
    %c1_84 = arith.constant 1 : index
    %c1_85 = arith.constant 1 : index
    %c0_86 = arith.constant 0 : index
    %52 = vector.load %arg8[%c0_83, %c1_84, %c1_85, %c0_86] : memref<2x10x10x8xf32, #tpu.memory_space<vmem>>, vector<2x8x8x8xf32>
    %c0_87 = arith.constant 0 : index
    %c1_88 = arith.constant 1 : index
    %c2_89 = arith.constant 2 : index
    %c0_90 = arith.constant 0 : index
    %53 = vector.load %arg8[%c0_87, %c1_88, %c2_89, %c0_90] : memref<2x10x10x8xf32, #tpu.memory_space<vmem>>, vector<2x8x8x8xf32>
    %c0_91 = arith.constant 0 : index
    %c2_92 = arith.constant 2 : index
    %c0_93 = arith.constant 0 : index
    %c0_94 = arith.constant 0 : index
    %54 = vector.load %arg8[%c0_91, %c2_92, %c0_93, %c0_94] : memref<2x10x10x8xf32, #tpu.memory_space<vmem>>, vector<2x8x8x8xf32>
    %c0_95 = arith.constant 0 : index
    %c2_96 = arith.constant 2 : index
    %c1_97 = arith.constant 1 : index
    %c0_98 = arith.constant 0 : index
    %55 = vector.load %arg8[%c0_95, %c2_96, %c1_97, %c0_98] : memref<2x10x10x8xf32, #tpu.memory_space<vmem>>, vector<2x8x8x8xf32>
    %c0_99 = arith.constant 0 : index
    %c2_100 = arith.constant 2 : index
    %c2_101 = arith.constant 2 : index
    %c0_102 = arith.constant 0 : index
    %56 = vector.load %arg8[%c0_99, %c2_100, %c2_101, %c0_102] : memref<2x10x10x8xf32, #tpu.memory_space<vmem>>, vector<2x8x8x8xf32>
    %57 = tpu.concatenate %48, %49, %50, %51, %52, %53, %54, %55, %56 in 3 : vector<2x8x8x8xf32>, vector<2x8x8x8xf32>, vector<2x8x8x8xf32>, vector<2x8x8x8xf32>, vector<2x8x8x8xf32>, vector<2x8x8x8xf32>, vector<2x8x8x8xf32>, vector<2x8x8x8xf32>, vector<2x8x8x8xf32> -> vector<2x8x8x72xf32>
    %58 = vector.shape_cast %57 : vector<2x8x8x72xf32> to vector<128x72xf32>
    %c0_103 = arith.constant 0 : index
    %c0_104 = arith.constant 0 : index
    %59 = vector.load %arg4[%c0_103, %c0_104] : memref<72x8xf32, #tpu.memory_space<vmem>>, vector<72x8xf32>
    %cst_105 = arith.constant dense<0.000000e+00> : vector<128x8xf32>
    %60 = tpu.matmul %58, %59, %cst_105 {dimension_numbers = #tpu.dot_dimension_numbers<[1], [0], [0], [1], [0, 0, 1, 1], [], []>} : vector<128x72xf32>, vector<72x8xf32>, vector<128x8xf32> -> vector<128x8xf32>
    %cst_106 = arith.constant dense<0.000000e+00> : vector<8xf32>
    %61 = vector.multi_reduction <add>, %60, %cst_106 [0] : vector<128x8xf32> to vector<8xf32>
    %62 = vector.shape_cast %61 : vector<8xf32> to vector<1x8xf32>
    %cst_107 = arith.constant 1.280000e+02 : f32
    %63 = vector.broadcast %cst_107 : f32 to vector<1x8xf32>
    %64 = arith.divf %62, %63 : vector<1x8xf32>
    %65 = vector.broadcast %64 : vector<1x8xf32> to vector<128x8xf32>
    %66 = arith.subf %60, %65 : vector<128x8xf32>
    %67 = arith.mulf %66, %66 : vector<128x8xf32>
    %cst_108 = arith.constant dense<0.000000e+00> : vector<8xf32>
    %68 = vector.multi_reduction <add>, %67, %cst_108 [0] : vector<128x8xf32> to vector<8xf32>
    %69 = vector.shape_cast %68 : vector<8xf32> to vector<1x8xf32>
    %cst_109 = arith.constant 1.280000e+02 : f32
    %70 = vector.broadcast %cst_109 : f32 to vector<1x8xf32>
    %71 = arith.divf %69, %70 : vector<1x8xf32>
    %c0_110 = arith.constant 0 : index
    %c0_111 = arith.constant 0 : index
    %72 = vector.load %arg5[%c0_110, %c0_111] : memref<1x8xf32, #tpu.memory_space<vmem>>, vector<1x8xf32>
    %cst_112 = arith.constant 9.99999974E-6 : f32
    %73 = vector.broadcast %cst_112 : f32 to vector<1x8xf32>
    %74 = arith.addf %71, %73 : vector<1x8xf32>
    %75 = math.rsqrt %74 : vector<1x8xf32>
    %76 = arith.mulf %72, %75 : vector<1x8xf32>
    %c0_113 = arith.constant 0 : index
    %c0_114 = arith.constant 0 : index
    %77 = vector.load %arg6[%c0_113, %c0_114] : memref<1x8xf32, #tpu.memory_space<vmem>>, vector<1x8xf32>
    %78 = arith.mulf %64, %76 : vector<1x8xf32>
    %79 = arith.subf %77, %78 : vector<1x8xf32>
    %80 = vector.broadcast %76 : vector<1x8xf32> to vector<128x8xf32>
    %81 = arith.mulf %60, %80 : vector<128x8xf32>
    %82 = vector.broadcast %79 : vector<1x8xf32> to vector<128x8xf32>
    %83 = arith.addf %81, %82 : vector<128x8xf32>
    %cst_115 = arith.constant 0.000000e+00 : f32
    %84 = vector.broadcast %cst_115 : f32 to vector<128x8xf32>
    %85 = arith.maximumf %83, %84 : vector<128x8xf32>
    %c0_116 = arith.constant 0 : index
    %c0_117 = arith.constant 0 : index
    %86 = vector.load %arg7[%c0_116, %c0_117] : memref<128x8xf32, #tpu.memory_space<vmem>>, vector<128x8xf32>
    tpu.vector_store %arg7[%c0_116, %c0_117], %85 {strides = array<i32>} : memref<128x8xf32, #tpu.memory_space<vmem>>, vector<128x8xf32>,
    return
  }
}

</mosaic_0001>

<bundles_post_ra>
// kernel: tpu_custom_call.1
= control target key start
LH: loop header
LB: loop body
LE: loop exit
PB: predicated region body
PF: predicated region fallthrough
CT: control target
= control target key end

     0   :  { %vm234_vm0 = vcmask 64512   ;;  %vm236_vm1 = vcmask 58368   ;;  %vm185_vm2 = vcmask 31744   ;;  %v2935_v0 = vmov 0.0   ;;  %s2936_s12 = smov 8   ;;  %s2937_s13 = smov 4   ;;  %s4555_s0 = inlined_call_operand.vmem [shape: f32[2,16,16,4], index: 0, kind: input, shape index: {}]   ;;  %s4556_s1 = inlined_call_operand.vmem [shape: f32[36,8], index: 1, kind: input, shape index: {}]   ;;  %s4557_s2 = inlined_call_operand.vmem [shape: f32[1,8], index: 2, kind: input, shape index: {}]   ;;  %s4558_s3 = inlined_call_operand.vmem [shape: f32[1,8], index: 3, kind: input, shape index: {}]   ;;  %s4559_s4 = inlined_call_operand.vmem [shape: f32[72,8], index: 4, kind: input, shape index: {}]   ;;  %s4560_s5 = inlined_call_operand.vmem [shape: f32[1,8], index: 5, kind: input, shape index: {}]   ;;  %s4561_s6 = inlined_call_operand.vmem [shape: f32[1,8], index: 6, kind: input, shape index: {}]   ;;  %s4562_s7 = inlined_call_operand.vmem [shape: f32[128,8], index: 7, kind: output, shape index: {}]  }
   0x1   :  { %235 = vst.msk [vmem:[#allocation2] sm:$0xff] %vm234_vm0, %v2935_v0  ;;  %238 = vst.msk [vmem:[#allocation2 + $0x10] sm:$0xff] %vm234_vm0, %v2935_v0  ;;  %v26_v1 = vld [vmem:[%s4555_s0] ss:$2 sm:$0xff]  ;;  %v2665_v2 = vld [vmem:[%s4555_s0 + $0x10] ss:$2 sm:$0xff] }
   0x2   :  { %237 = vst.msk [vmem:[#allocation2 + $0x8] sm:$0x3] %vm236_vm1, %v2935_v0  ;;  %239 = vst.msk [vmem:[#allocation2 + $0x18] sm:$0x3] %vm236_vm1, %v2935_v0  ;;  %v2696_v3 = vld [vmem:[%s4555_s0 + $0x1] ss:$2 sm:$0xff] }
   0x3   :  { %240 = vst.msk [vmem:[#allocation2 + $0x20] sm:$0xff] %vm234_vm0, %v2935_v0  ;;  %242 = vst.msk [vmem:[#allocation2 + $0x30] sm:$0xff] %vm234_vm0, %v2935_v0  ;;  %v2697_v4 = vld [vmem:[%s4555_s0 + $0x11] ss:$2 sm:$0xff]  ;;  %v153_v5 = vmax.f32 %v26_v1, %v2696_v3  ;;  %v2666_v6 = vld [vmem:[%s4555_s0 + $0x20] ss:$2 sm:$0xff] }
   0x4   :  { %241 = vst.msk [vmem:[#allocation2 + $0x28] sm:$0x3] %vm236_vm1, %v2935_v0  ;;  %243 = vst.msk [vmem:[#allocation2 + $0x38] sm:$0x3] %vm236_vm1, %v2935_v0  ;;  %v2667_v7 = vld [vmem:[%s4555_s0 + $0x30] ss:$2 sm:$0xff]  ;;  %v154_v8 = vmax.f32 %v2665_v2, %v2697_v4 }
   0x5   :  { %244 = vst.msk [vmem:[#allocation2 + $0x40] sm:$0xff] %vm234_vm0, %v2935_v0  ;;  %246 = vst.msk [vmem:[#allocation2 + $0x50] sm:$0xff] %vm234_vm0, %v2935_v0  ;;  %v2698_v9 = vld [vmem:[%s4555_s0 + $0x21] ss:$2 sm:$0xff]  ;;  %v2699_v10 = vld [vmem:[%s4555_s0 + $0x31] ss:$2 sm:$0xff] }
   0x6   :  { %245 = vst.msk [vmem:[#allocation2 + $0x48] sm:$0x3] %vm236_vm1, %v2935_v0  ;;  %247 = vst.msk [vmem:[#allocation2 + $0x58] sm:$0x3] %vm236_vm1, %v2935_v0  ;;  %v186_v11 = vsel %vm185_vm2, %v153_v5, -inf  ;;  %v155_v12 = vmax.f32 %v2666_v6, %v2698_v9  ;;  %v156_v13 = vmax.f32 %v2667_v7, %v2699_v10  ;;  %v187_v16 = vsel %vm185_vm2, %v154_v8, -inf }
   0x7   :  { %248 = vst.msk [vmem:[#allocation2 + $0x60] sm:$0xff] %vm234_vm0, %v2935_v0  ;;  %250 = vst.msk [vmem:[#allocation2 + $0x70] sm:$0xff] %vm234_vm0, %v2935_v0  ;;  %v2668_v14 = vld [vmem:[%s4555_s0 + $0x40] ss:$2 sm:$0xff]  ;;  %v2669_v15 = vld [vmem:[%s4555_s0 + $0x50] ss:$2 sm:$0xff]  ;;  %v188_v19 = vmax.f32 %v186_v11, %v187_v16 }
   0x8   :  { %249 = vst.msk [vmem:[#allocation2 + $0x68] sm:$0x3] %vm236_vm1, %v2935_v0  ;;  %251 = vst.msk [vmem:[#allocation2 + $0x78] sm:$0x3] %vm236_vm1, %v2935_v0  ;;  %v2700_v17 = vld [vmem:[%s4555_s0 + $0x41] ss:$2 sm:$0xff] }
   0x9   :  { %252 = vst.msk [vmem:[#allocation2 + $0x80] sm:$0xff] %vm234_vm0, %v2935_v0  ;;  %254 = vst.msk [vmem:[#allocation2 + $0x90] sm:$0xff] %vm234_vm0, %v2935_v0  ;;  %v2701_v18 = vld [vmem:[%s4555_s0 + $0x51] ss:$2 sm:$0xff]  ;;  %v189_v20 = vsel %vm185_vm2, %v155_v12, -inf  ;;  %v190_v21 = vsel %vm185_vm2, %v156_v13, -inf  ;;  %v157_v22 = vmax.f32 %v2668_v14, %v2700_v17 }
   0xa   :  { %253 = vst.msk [vmem:[#allocation2 + $0x88] sm:$0x3] %vm236_vm1, %v2935_v0  ;;  %255 = vst.msk [vmem:[#allocation2 + $0x98] sm:$0x3] %vm236_vm1, %v2935_v0  ;;  %v2670_v23 = vld [vmem:[%s4555_s0 + $0x60] ss:$2 sm:$0xff]  ;;  %v191_v24 = vmax.f32 %v189_v20, %v190_v21  ;;  %v158_v25 = vmax.f32 %v2669_v15, %v2701_v18 }
   0xb   :  { %256 = vst.msk [vmem:[#allocation2 + $0xa0] sm:$0xff] %vm234_vm0, %v2935_v0  ;;  %258 = vst.msk [vmem:[#allocation2 + $0xb0] sm:$0xff] %vm234_vm0, %v2935_v0  ;;  %v2671_v26 = vld [vmem:[%s4555_s0 + $0x70] ss:$2 sm:$0xff]  ;;  %v2702_v27 = vld [vmem:[%s4555_s0 + $0x61] ss:$2 sm:$0xff] }
   0xc   :  { %257 = vst.msk [vmem:[#allocation2 + $0xa8] sm:$0x3] %vm236_vm1, %v2935_v0  ;;  %259 = vst.msk [vmem:[#allocation2 + $0xb8] sm:$0x3] %vm236_vm1, %v2935_v0  ;;  %v2703_v28 = vld [vmem:[%s4555_s0 + $0x71] ss:$2 sm:$0xff]  ;;  %v159_v32 = vmax.f32 %v2670_v23, %v2702_v27 }
   0xd   :  { %260 = vst.msk [vmem:[#allocation2 + $0xc0] sm:$0xff] %vm234_vm0, %v2935_v0  ;;  %262 = vst.msk [vmem:[#allocation2 + $0xd0] sm:$0xff] %vm234_vm0, %v2935_v0  ;;  %v325_v29 = vld [vmem:[#allocation2 + $0x2] sm:$0xff]  ;;  %v192_v31 = vsel %vm185_vm2, %v157_v22, -inf  ;;  %v160_v33 = vmax.f32 %v2671_v26, %v2703_v28  ;;  %v193_v35 = vsel %vm185_vm2, %v158_v25, -inf  ;;  %s2938_s29 = smov 12  }
   0xe   :  { %261 = vst.msk [vmem:[#allocation2 + $0xc8] sm:$0x3] %vm236_vm1, %v2935_v0  ;;  %263 = vst.msk [vmem:[#allocation2 + $0xd8] sm:$0x3] %vm236_vm1, %v2935_v0  ;;  %v309_v30 = vld [vmem:[#allocation2 + $0x1] sm:$0xff]  ;;  %518 = vrot.lane.b32.xlu1 %v325_v29, %s2936_s12  ;;  %v194_v38 = vmax.f32 %v192_v31, %v193_v35  ;;  %v195_v39 = vsel %vm185_vm2, %v159_v32, -inf }
   0xf   :  { %264 = vst.msk [vmem:[#allocation2 + $0xe0] sm:$0xff] %vm234_vm0, %v2935_v0  ;;  %266 = vst.msk [vmem:[#allocation2 + $0xf0] sm:$0xff] %vm234_vm0, %v2935_v0  ;;  %v2672_v34 = vld [vmem:[%s4555_s0 + $0x80] ss:$2 sm:$0xff]  ;;  %454 = vrot.lane.b32.xlu0 %v309_v30, %s2937_s13  ;;  %v2673_v36 = vld [vmem:[%s4555_s0 + $0x90] ss:$2 sm:$0xff] }
  0x10   :  { %265 = vst.msk [vmem:[#allocation2 + $0xe8] sm:$0x3] %vm236_vm1, %v2935_v0  ;;  %267 = vst.msk [vmem:[#allocation2 + $0xf8] sm:$0x3] %vm236_vm1, %v2935_v0  ;;  %v2704_v37 = vld [vmem:[%s4555_s0 + $0x81] ss:$2 sm:$0xff] }
  0x11   :  { %268 = vst.msk [vmem:[#allocation2 + $0x100] sm:$0xff] %vm234_vm0, %v2935_v0  ;;  %270 = vst.msk [vmem:[#allocation2 + $0x110] sm:$0xff] %vm234_vm0, %v2935_v0  ;;  %v196_v40 = vsel %vm185_vm2, %v160_v33, -inf  ;;  %v2705_v41 = vld [vmem:[%s4555_s0 + $0x91] ss:$2 sm:$0xff]  ;;  %v161_v42 = vmax.f32 %v2672_v34, %v2704_v37  ;;  %s2939_s19 = smov 16  }
  0x12   :  { %269 = vst.msk [vmem:[#allocation2 + $0x108] sm:$0x3] %vm236_vm1, %v2935_v0  ;;  %271 = vst.msk [vmem:[#allocation2 + $0x118] sm:$0x3] %vm236_vm1, %v2935_v0  ;;  %v2674_v43 = vld [vmem:[%s4555_s0 + $0xa0] ss:$2 sm:$0xff]  ;;  %v197_v44 = vmax.f32 %v195_v39, %v196_v40  ;;  %v162_v45 = vmax.f32 %v2673_v36, %v2705_v41 }
  0x13   :  { %272 = vst.msk [vmem:[#allocation2 + $0x120] sm:$0xff] %vm234_vm0, %v2935_v0  ;;  %274 = vst.msk [vmem:[#allocation2 + $0x130] sm:$0xff] %vm234_vm0, %v2935_v0  ;;  %v2675_v46 = vld [vmem:[%s4555_s0 + $0xb0] ss:$2 sm:$0xff]  ;;  %v2706_v47 = vld [vmem:[%s4555_s0 + $0xa1] ss:$2 sm:$0xff] }
  0x14   :  { %273 = vst.msk [vmem:[#allocation2 + $0x128] sm:$0x3] %vm236_vm1, %v2935_v0  ;;  %275 = vst.msk [vmem:[#allocation2 + $0x138] sm:$0x3] %vm236_vm1, %v2935_v0  ;;  %v2707_v48 = vld [vmem:[%s4555_s0 + $0xb1] ss:$2 sm:$0xff]  ;;  %v163_v50 = vmax.f32 %v2674_v43, %v2706_v47 }
  0x15   :  { %277 = vst.msk [vmem:[#allocation2 + $0x11] sm:$0xff] %vm185_vm2, %v188_v19  ;;  %278 = vst.msk [vmem:[#allocation2 + $0x21] sm:$0xff] %vm185_vm2, %v191_v24  ;;  %v198_v49 = vsel %vm185_vm2, %v161_v42, -inf  ;;  %v164_v51 = vmax.f32 %v2675_v46, %v2707_v48  ;;  %v2676_v52 = vld [vmem:[%s4555_s0 + $0xc0] ss:$2 sm:$0xff]  ;;  %v199_v54 = vsel %vm185_vm2, %v162_v45, -inf }
  0x16   :  { %279 = vst.msk [vmem:[#allocation2 + $0x31] sm:$0xff] %vm185_vm2, %v194_v38  ;;  %v2677_v53 = vld [vmem:[%s4555_s0 + $0xd0] ss:$2 sm:$0xff]  ;;  %280 = vst.msk [vmem:[#allocation2 + $0x41] sm:$0xff] %vm185_vm2, %v197_v44  ;;  %v2708_v55 = vld [vmem:[%s4555_s0 + $0xc1] ss:$2 sm:$0xff]  ;;  %v200_v57 = vmax.f32 %v198_v49, %v199_v54 }
  0x17   :  { %v2709_v56 = vld [vmem:[%s4555_s0 + $0xd1] ss:$2 sm:$0xff]  ;;  %v201_v58 = vsel %vm185_vm2, %v163_v50, -inf  ;;  %v202_v59 = vsel %vm185_vm2, %v164_v51, -inf  ;;  %v165_v60 = vmax.f32 %v2676_v52, %v2708_v55  ;;  %v2678_v61 = vld [vmem:[%s4555_s0 + $0xe0] ss:$2 sm:$0xff] }
  0x18   :  { %v203_v0 = vmax.f32 %v201_v58, %v202_v59  ;;  %v166_v1 = vmax.f32 %v2677_v53, %v2709_v56  ;;  %v2679_v2 = vld [vmem:[%s4555_s0 + $0xf0] ss:$2 sm:$0xff]  ;;  %281 = vst.msk [vmem:[#allocation2 + $0x51] sm:$0xff] %vm185_vm2, %v200_v57  ;;  %v2710_v7 = vld [vmem:[%s4555_s0 + $0xe1] ss:$2 sm:$0xff]  ;;  %s2940_s28 = smov 20  }
  0x19   :  { %v204_v4 = vsel %vm185_vm2, %v165_v60, -inf  ;;  %v2711_v8 = vld [vmem:[%s4555_s0 + $0xf1] ss:$2 sm:$0xff]  ;;  %v167_v10 = vmax.f32 %v2678_v61, %v2710_v7  ;;  %v2680_v12 = vld [vmem:[%s4555_s0 + $0x100] ss:$2 sm:$0xff]  ;;  %s2941_s30 = smov 24  }
  0x1a   :  { %282 = vst.msk [vmem:[#allocation2 + $0x61] sm:$0xff] %vm185_vm2, %v203_v0  ;;  %v205_v6 = vsel %vm185_vm2, %v166_v1, -inf  ;;  %v168_v11 = vmax.f32 %v2679_v2, %v2711_v8  ;;  %v2712_v13 = vld [vmem:[%s4555_s0 + $0x101] ss:$2 sm:$0xff]  ;;  %v2681_v14 = vld [vmem:[%s4555_s0 + $0x110] ss:$2 sm:$0xff] }
  0x1b   :  { %v206_v9 = vmax.f32 %v204_v4, %v205_v6  ;;  %v169_v15 = vmax.f32 %v2680_v12, %v2712_v13  ;;  %v207_v16 = vsel %vm185_vm2, %v167_v10, -inf  ;;  %v2713_v20 = vld [vmem:[%s4555_s0 + $0x111] ss:$2 sm:$0xff]  ;;  %v2682_v22 = vld [vmem:[%s4555_s0 + $0x120] ss:$2 sm:$0xff]  ;;  %s2942_s27 = smov 28  }
  0x1c   :  { %v326_v62 = vld [vmem:[#allocation2 + $0x12] sm:$0xff]  ;;  %v3142_v5 = vld [vmem:[#allocation2 + $0x20] sm:$0xff]  ;;  %v208_v17 = vsel %vm185_vm2, %v168_v11, -inf  ;;  %v170_v23 = vmax.f32 %v2681_v14, %v2713_v20  ;;  %v1085_v48 = vld [vmem:[%s4556_s1 + $0x8] sm:$0xff]  ;;  %vm1138_vm3 = vcmask 1043456   ;;  %vm982_vm4 = vcmask 97280  }
  0x1d   :  { %v310_v63 = vld [vmem:[#allocation2 + $0x11] sm:$0xff]  ;;  %520 = vrot.lane.b32.xlu1 %v326_v62, %s2936_s12  ;;  %283 = vst.msk [vmem:[#allocation2 + $0x71] sm:$0xff] %vm185_vm2, %v206_v9  ;;  %v3168_v18 = vld [vmem:[#allocation2 + $0x21] sm:$0xff]  ;;  %v209_v19 = vmax.f32 %v207_v16, %v208_v17  ;;  %v210_v21 = vsel %vm185_vm2, %v169_v15, -inf  ;;  %vm999_vm5 = vcmask 130048   ;;  %vm1016_vm6 = vcmask 162816  }
  0x1e   :  { %456 = vrot.lane.b32.xlu0 %v310_v63, %s2937_s13  ;;  %v3138_v3 = vld [vmem:[#allocation2 + $0x10] sm:$0xff]  ;;  %v2714_v25 = vld [vmem:[%s4555_s0 + $0x121] ss:$2 sm:$0xff]  ;;  %v211_v29 = vsel %vm185_vm2, %v170_v23, -inf  ;;  %v2684_v33 = vld [vmem:[%s4555_s0 + $0x140] ss:$2 sm:$0xff] }
  0x1f   :  { %v2683_v24 = vld [vmem:[%s4555_s0 + $0x130] ss:$2 sm:$0xff]  ;;  %v2715_v26 = vld [vmem:[%s4555_s0 + $0x131] ss:$2 sm:$0xff]  ;;  %284 = vst.msk [vmem:[#allocation2 + $0x81] sm:$0xff] %vm185_vm2, %v209_v19  ;;  %v171_v27 = vmax.f32 %v2682_v22, %v2714_v25  ;;  %v212_v30 = vmax.f32 %v210_v21, %v211_v29  ;;  %v327_v40 = vld [vmem:[#allocation2 + $0x22] sm:$0xff] }
  0x20   :  { %v172_v28 = vmax.f32 %v2683_v24, %v2715_v26  ;;  %v2685_v34 = vld [vmem:[%s4555_s0 + $0x150] ss:$2 sm:$0xff]  ;;  %v2716_v36 = vld [vmem:[%s4555_s0 + $0x141] ss:$2 sm:$0xff]  ;;  %v2717_v37 = vld [vmem:[%s4555_s0 + $0x151] ss:$2 sm:$0xff] }
  0x21   :  { %584 = vrot.lane.b32.xlu1 %v3142_v5, %s2938_s29  ;;  %v213_v31 = vsel %vm185_vm2, %v171_v27, -inf  ;;  %285 = vst.msk [vmem:[#allocation2 + $0xb1] sm:$0xff] %vm185_vm2, %v212_v30  ;;  %v173_v38 = vmax.f32 %v2684_v33, %v2716_v36  ;;  %v174_v39 = vmax.f32 %v2685_v34, %v2717_v37  ;;  %v312_v41 = vld [vmem:[#allocation2 + $0x31] sm:$0xff]  ;;  %v1084_v47 = vld [vmem:[%s4556_s1] sm:$0xff]  ;;  %vm1033_vm7 = vcmask 195584  }
  0x22   :  { %582 = vrot.lane.b32.xlu0 %v3138_v3, %s2938_s29  ;;  %v214_v32 = vsel %vm185_vm2, %v172_v28, -inf  ;;  %v3215_v45 = vld [vmem:[#allocation2 + $0x30] sm:$0xff]  ;;  %v2883_v49 = vpack.c.bf16 %v1085_v48, %v1084_v47  ;;  %v2686_v50 = vld [vmem:[%s4555_s0 + $0x160] ss:$2 sm:$0xff]  ;;  %v2718_v52 = vld [vmem:[%s4555_s0 + $0x161] ss:$2 sm:$0xff] }
  0x23   :  { %v215_v35 = vmax.f32 %v213_v31, %v214_v32  ;;  %v216_v42 = vsel %vm185_vm2, %v173_v38, -inf  ;;  %v217_v43 = vsel %vm185_vm2, %v174_v39, -inf  ;;  %v328_v46 = vld [vmem:[#allocation2 + $0x32] sm:$0xff]  ;;  %v175_v54 = vmax.f32 %v2686_v50, %v2718_v52  ;;  %v2688_v0 = vld [vmem:[%s4555_s0 + $0x180] ss:$2 sm:$0xff] }
  0x24   :  { %v218_v44 = vmax.f32 %v216_v42, %v217_v43  ;;  %v2687_v51 = vld [vmem:[%s4555_s0 + $0x170] ss:$2 sm:$0xff]  ;;  %v2719_v53 = vld [vmem:[%s4555_s0 + $0x171] ss:$2 sm:$0xff]  ;;  %2884 = vmatprep.subr.bf16.mxu0 %v2883_v49  ;;  %v2720_v2 = vld [vmem:[%s4555_s0 + $0x181] ss:$2 sm:$0xff] }
  0x25   :  { %458 = vrot.lane.b32.xlu1 %v3168_v18, %s2937_s13  ;;  %286 = vst.msk [vmem:[#allocation2 + $0xc1] sm:$0xff] %vm185_vm2, %v215_v35  ;;  %v176_v55 = vmax.f32 %v2687_v51, %v2719_v53  ;;  %v1086_v56 = vld [vmem:[%s4556_s1 + $0x10] sm:$0xff]  ;;  %v1087_v57 = vld [vmem:[%s4556_s1 + $0x18] sm:$0xff]  ;;  %v219_v58 = vsel %vm185_vm2, %v175_v54, -inf  ;;  %2886 = vmatpush3.bf16.msra.mxu0 %v2883_v49  ;;  %v360_v6 = vld [vmem:[#allocation2 + $0x41] sm:$0xff]  ;;  %v177_v7 = vmax.f32 %v2688_v0, %v2720_v2  ;;  %vm1050_vm8 = vcmask 228352  }
  0x26   :  { %646 = vrot.lane.b32.xlu0 %v310_v63, %s2939_s19  ;;  %287 = vst.msk [vmem:[#allocation2 + $0xd1] sm:$0xff] %vm185_vm2, %v218_v44  ;;  %v2887_v59 = vpack.c.bf16 %v1087_v57, %v1086_v56  ;;  %v3257_v63 = vld [vmem:[#allocation2 + $0x40] sm:$0xff]  ;;  %v2689_v1 = vld [vmem:[%s4555_s0 + $0x190] ss:$2 sm:$0xff]  ;;  %v2721_v4 = vld [vmem:[%s4555_s0 + $0x191] ss:$2 sm:$0xff] }
  0x27   :  { %v220_v60 = vsel %vm185_vm2, %v176_v55, -inf  ;;  %v178_v8 = vmax.f32 %v2689_v1, %v2721_v4  ;;  %v222_v9 = vsel %vm185_vm2, %v177_v7, -inf  ;;  %v329_v12 = vld [vmem:[#allocation2 + $0x42] sm:$0xff]  ;;  %v314_v13 = vld [vmem:[#allocation2 + $0x51] sm:$0xff]  ;;  %vm1067_vm9 = vcmask 261120  }
  0x28   :  { %v221_v61 = vmax.f32 %v219_v58, %v220_v60  ;;  %2888 = vmatprep.subr.bf16.mxu0 %v2887_v59  ;;  %v2690_v14 = vld [vmem:[%s4555_s0 + $0x1a0] ss:$2 sm:$0xff]  ;;  %v2691_v15 = vld [vmem:[%s4555_s0 + $0x1b0] ss:$2 sm:$0xff]  ;;  %v2722_v16 = vld [vmem:[%s4555_s0 + $0x1a1] ss:$2 sm:$0xff] }
  0x29   :  { %710 = vrot.lane.b32.xlu1 %v326_v62, %s2940_s28  ;;  %v1088_v62 = vld [vmem:[%s4556_s1 + $0x20] sm:$0xf]  ;;  %2890 = vmatpush3.bf16.msra.mxu0 %v2887_v59  ;;  %s2943_s1 = smov 32   ;;  %v223_v10 = vsel %vm185_vm2, %v178_v8, -inf  ;;  %v2723_v17 = vld [vmem:[%s4555_s0 + $0x1b1] ss:$2 sm:$0xff] }
  0x2a   :  { %648 = vrot.lane.b32.xlu0 %v3168_v18, %s2939_s19  ;;  %288 = vst.msk [vmem:[#allocation2 + $0xe1] sm:$0xff] %vm185_vm2, %v221_v61  ;;  %2815 = vmatprep.subr.msk.mxu0 %vm1138_vm3, %v1088_v62  ;;  %v224_v11 = vmax.f32 %v222_v9, %v223_v10  ;;  %v3300_v19 = vld [vmem:[#allocation2 + $0x50] sm:$0xff]  ;;  %v180_v21 = vmax.f32 %v2691_v15, %v2723_v17  ;;  %v3311_v25 = vld [vmem:[#allocation2 + $0x60] sm:$0xff]  ;;  %vm1089_vm10 = vcmask 293888   ;;  %vm2199_vm11 = vcmask 326656  }
  0x2b   :  { %v330_v20 = vld [vmem:[#allocation2 + $0x52] sm:$0xff]  ;;  %v2692_v26 = vld [vmem:[%s4555_s0 + $0x1c0] ss:$2 sm:$0xff]  ;;  %v2724_v28 = vld [vmem:[%s4555_s0 + $0x1c1] ss:$2 sm:$0xff]  ;;  %vm2216_vm12 = vcmask 392192  }
  0x2c   :  { %289 = vst.msk [vmem:[#allocation2 + $0xf1] sm:$0xff] %vm185_vm2, %v224_v11  ;;  %v226_v23 = vsel %vm185_vm2, %v180_v21, -inf  ;;  %v2693_v27 = vld [vmem:[%s4555_s0 + $0x1d0] ss:$2 sm:$0xff]  ;;  %v2725_v29 = vld [vmem:[%s4555_s0 + $0x1d1] ss:$2 sm:$0xff]  ;;  %v181_v30 = vmax.f32 %v2692_v26, %v2724_v28 }
  0x2d   :  { %522 = vrot.lane.b32.xlu1 %v327_v40, %s2936_s12  ;;  %2816 = vmatpush3.msk.msra.mxu0 %vm1138_vm3, %v1088_v62  ;;  %v362_v31 = vld [vmem:[#allocation2 + $0x61] sm:$0xff]  ;;  %v182_v32 = vmax.f32 %v2693_v27, %v2725_v29  ;;  %v316_v37 = vld [vmem:[#allocation2 + $0x71] sm:$0xff]  ;;  %vm2233_vm13 = vcmask 457728   ;;  %vm2250_vm14 = vcmask 523264   ;;  %vm2276_vm15 = vcmask 588800  }
  0x2e   :  { %460 = vrot.lane.b32.xlu0 %v312_v41, %s2937_s13  ;;  %v228_v33 = vsel %vm185_vm2, %v181_v30, -inf  ;;  %v331_v36 = vld [vmem:[#allocation2 + $0x62] sm:$0xff]  ;;  %v2695_v39 = vld [vmem:[%s4555_s0 + $0x1f0] ss:$2 sm:$0xff] }
  0x2f   :  { %v229_v34 = vsel %vm185_vm2, %v182_v32, -inf  ;;  %v2694_v38 = vld [vmem:[%s4555_s0 + $0x1e0] ss:$2 sm:$0xff]  ;;  %v3354_v43 = vld [vmem:[#allocation2 + $0x70] sm:$0xff] }
  0x30   :  { %v230_v35 = vmax.f32 %v228_v33, %v229_v34  ;;  %v332_v44 = vld [vmem:[#allocation2 + $0x72] sm:$0xff]  ;;  %v348_v50 = vld [vmem:[#allocation2 + $0x80] sm:$0xff] }
  0x31   :  { %774 = vrot.lane.b32.xlu1 %v3142_v5, %s2941_s30  ;;  %v364_v51 = vld [vmem:[#allocation2 + $0x81] sm:$0xff]  ;;  %v318_v56 = vld [vmem:[#allocation2 + $0xb1] sm:$0xff] }
  0x32   :  { %712 = vrot.lane.b32.xlu0 %v327_v40, %s2940_s28  ;;  %291 = vst.msk [vmem:[#allocation2 + $0x111] sm:$0xff] %vm185_vm2, %v230_v35  ;;  %v317_v52 = vld [vmem:[#allocation2 + $0xa1] sm:$0xff]  ;;  %v3379_v60 = vld [vmem:[#allocation2 + $0xb0] sm:$0xff] }
  0x33   :  { %v333_v55 = vld [vmem:[#allocation2 + $0xa2] sm:$0xff]  ;;  %v334_v61 = vld [vmem:[#allocation2 + $0xb2] sm:$0xff] }
  0x34   :  { %v380_v57 = vld [vmem:[#allocation2 + $0x82] sm:$0xff]  ;;  %v397_v1 = vld [vmem:[#allocation2 + $0x90] sm:$0xff] }
  0x35   :  { %586 = vrot.lane.b32.xlu1 %v3215_v45, %s2938_s29  ;;  %v413_v9 = vld [vmem:[#allocation2 + $0x91] sm:$0xff] }
  0x36   :  { %524 = vrot.lane.b32.xlu0 %v328_v46, %s2936_s12  ;;  %v429_v15 = vld [vmem:[#allocation2 + $0x92] sm:$0xff] }
  0x37   :  { %v320_v21 = vld [vmem:[#allocation2 + $0xd1] sm:$0xff] }
  0x38   :  { %v3422_v33 = vld [vmem:[#allocation2 + $0xd0] sm:$0xff] }
  0x39   :  { %838 = vrot.lane.b32.xlu1 %v3168_v18, %s2942_s27  ;;  %v179_v18 = vmax.f32 %v2690_v14, %v2722_v16  ;;  %v336_v34 = vld [vmem:[#allocation2 + $0xd2] sm:$0xff] }
  0x3a   :  { %776 = vrot.lane.b32.xlu0 %v3215_v45, %s2941_s30 }
  0x3b   :  { %v225_v22 = vsel %vm185_vm2, %v179_v18, -inf  ;;  %v293_v18 = vld [vmem:[#allocation2] sm:$0xff] }
  0x3c   :  { %v227_v24 = vmax.f32 %v225_v22, %v226_v23 }
  0x3d   :  { %650 = vrot.lane.b32.xlu1 %v312_v41, %s2939_s19 }
  0x3e   :  { %588 = vrot.lane.b32.xlu0 %v3257_v63, %s2938_s29  ;;  %290 = vst.msk [vmem:[#allocation2 + $0x101] sm:$0xff] %vm185_vm2, %v227_v24 }
  0x41   :  { %902 = vrot.lane.b32.xlu1 %v327_v40, %s2943_s1  ;;  %v2726_v40 = vld [vmem:[%s4555_s0 + $0x1e1] ss:$2 sm:$0xff] }
  0x42   :  { %840 = vrot.lane.b32.xlu0 %v312_v41, %s2942_s27  ;;  %v2727_v41 = vld [vmem:[%s4555_s0 + $0x1f1] ss:$2 sm:$0xff]  ;;  %v183_v42 = vmax.f32 %v2694_v38, %v2726_v40  ;;  %s2944_s0 = smov 48  }
  0x44   :  { %v231_v47 = vsel %vm185_vm2, %v183_v42, -inf }
  0x45   :  { %652 = vrot.lane.b32.xlu1 %v360_v6, %s2939_s19 }
  0x46   :  { %462 = vrot.lane.b32.xlu0 %v360_v6, %s2937_s13 }
  0x49   :  { %904 = vrot.lane.b32.xlu1 %v328_v46, %s2943_s1 }
  0x4a   :  { %714 = vrot.lane.b32.xlu0 %v328_v46, %s2940_s28  ;;  %v184_v46 = vmax.f32 %v2695_v39, %v2727_v41 }
  0x4c   :  { %v232_v48 = vsel %vm185_vm2, %v184_v46, -inf }
  0x4d   :  { %526 = vrot.lane.b32.xlu1 %v329_v12, %s2936_s12  ;;  %v233_v49 = vmax.f32 %v231_v47, %v232_v48  ;;  %v3444_v48 = vld [vmem:[#allocation2 + $0xe0] sm:$0xff] }
  0x4e   :  { %464 = vrot.lane.b32.xlu0 %v314_v13, %s2937_s13 }
  0x4f   :  { %292 = vst.msk [vmem:[#allocation2 + $0x121] sm:$0xff] %vm185_vm2, %v233_v49 }
  0x51   :  { %778 = vrot.lane.b32.xlu1 %v3257_v63, %s2941_s30 }
  0x52   :  { %716 = vrot.lane.b32.xlu0 %v329_v12, %s2940_s28 }
  0x55   :  { %590 = vrot.lane.b32.xlu1 %v3300_v19, %s2938_s29 }
  0x56   :  { %528 = vrot.lane.b32.xlu0 %v330_v20, %s2936_s12 }
  0x59   :  { %842 = vrot.lane.b32.xlu1 %v360_v6, %s2942_s27  ;;  %v3390_v6 = vld [vmem:[#allocation2 + $0xc0] sm:$0xff] }
  0x5a   :  { %780 = vrot.lane.b32.xlu0 %v3300_v19, %s2941_s30 }
  0x5d   :  { %654 = vrot.lane.b32.xlu1 %v314_v13, %s2939_s19 }
  0x5e   :  { %592 = vrot.lane.b32.xlu0 %v3311_v25, %s2938_s29 }
  0x61   :  { %906 = vrot.lane.b32.xlu1 %v329_v12, %s2943_s1  ;;  %v366_v12 = vld [vmem:[#allocation2 + $0xc1] sm:$0xff] }
  0x62   :  { %844 = vrot.lane.b32.xlu0 %v314_v13, %s2942_s27 }
  0x65   :  { %656 = vrot.lane.b32.xlu1 %v362_v31, %s2939_s19 }
  0x66   :  { %466 = vrot.lane.b32.xlu0 %v362_v31, %s2937_s13 }
  0x69   :  { %908 = vrot.lane.b32.xlu1 %v330_v20, %s2943_s1 }
  0x6a   :  { %718 = vrot.lane.b32.xlu0 %v330_v20, %s2940_s28  ;;  %v335_v20 = vld [vmem:[#allocation2 + $0xc2] sm:$0xff] }
  0x6d   :  { %530 = vrot.lane.b32.xlu1 %v331_v36, %s2936_s12 }
  0x6e   :  { %468 = vrot.lane.b32.xlu0 %v316_v37, %s2937_s13 }
  0x71   :  { %782 = vrot.lane.b32.xlu1 %v3311_v25, %s2941_s30 }
  0x72   :  { %720 = vrot.lane.b32.xlu0 %v331_v36, %s2940_s28 }
  0x75   :  { %594 = vrot.lane.b32.xlu1 %v3354_v43, %s2938_s29 }
  0x76   :  { %532 = vrot.lane.b32.xlu0 %v332_v44, %s2936_s12 }
  0x79   :  { %846 = vrot.lane.b32.xlu1 %v362_v31, %s2942_s27 }
  0x7a   :  { %784 = vrot.lane.b32.xlu0 %v3354_v43, %s2941_s30 }
  0x7d   :  { %658 = vrot.lane.b32.xlu1 %v316_v37, %s2939_s19 }
  0x7e   :  { %596 = vrot.lane.b32.xlu0 %v348_v50, %s2938_s29 }
  0x80   :  { %v519_v53 = vpop.permute.xlu1 %518 }
  0x81   :  { %910 = vrot.lane.b32.xlu1 %v331_v36, %s2943_s1  ;;  %v455_v54 = vpop.permute.xlu0 %454 }
  0x82   :  { %848 = vrot.lane.b32.xlu0 %v316_v37, %s2942_s27  ;;  %v950_v22 = vsel %vm185_vm2, %v293_v18, %v455_v54 }
  0x83   :  { %v966_v26 = vsel %vm234_vm0, %v950_v22, %v519_v53 }
  0x85   :  { %660 = vrot.lane.b32.xlu1 %v364_v51, %s2939_s19 }
  0x86   :  { %470 = vrot.lane.b32.xlu0 %v317_v52, %s2937_s13 }
  0x89   :  { %912 = vrot.lane.b32.xlu1 %v332_v44, %s2943_s1 }
  0x8a   :  { %722 = vrot.lane.b32.xlu0 %v332_v44, %s2940_s28 }
  0x8d   :  { %534 = vrot.lane.b32.xlu1 %v333_v55, %s2936_s12  ;;  %v368_v55 = vld [vmem:[#allocation2 + $0xe1] sm:$0xff] }
  0x8e   :  { %472 = vrot.lane.b32.xlu0 %v318_v56, %s2937_s13 }
  0x8f   :  { %v3375_v58 = vpop.permute.xlu1 %520 }
  0x90   :  { %v457_v59 = vpop.permute.xlu0 %456 }
  0x91   :  { %786 = vrot.lane.b32.xlu1 %v348_v50, %s2941_s30  ;;  %v951_v35 = vsel %vm185_vm2, %v3138_v3, %v457_v59 }
  0x92   :  { %724 = vrot.lane.b32.xlu0 %v380_v57, %s2940_s28  ;;  %v967_v40 = vsel %vm234_vm0, %v951_v35, %v3375_v58  ;;  %v370_v35 = vld [vmem:[#allocation2 + $0x101] sm:$0xff] }
  0x93   :  { %v3381_v62 = vpop.permute.xlu1 %584 }
  0x94   :  { %v583_v0 = vpop.permute.xlu0 %582  ;;  %v984_v3 = vsel %vm982_vm4, %v967_v40, %v3381_v62  ;;  %v322_v62 = vld [vmem:[#allocation2 + $0xf1] sm:$0xff]  ;;  %v339_v40 = vld [vmem:[#allocation2 + $0x102] sm:$0xff] }
  0x95   :  { %598 = vrot.lane.b32.xlu1 %v3379_v60, %s2938_s29  ;;  %v983_v27 = vsel %vm982_vm4, %v966_v26, %v583_v0 }
  0x96   :  { %536 = vrot.lane.b32.xlu0 %v334_v61, %s2936_s12 }
  0x97   :  { %v3386_v2 = vpop.permute.xlu1 %458 }
  0x98   :  { %v647_v4 = vpop.permute.xlu0 %646 }
  0x99   :  { %850 = vrot.lane.b32.xlu1 %v364_v51, %s2942_s27  ;;  %v1000_v30 = vsel %vm999_vm5, %v983_v27, %v647_v4  ;;  %v952_v4 = vsel %vm185_vm2, %v3142_v5, %v3386_v2  ;;  %v3483_v2 = vld [vmem:[#allocation2 + $0xf0] sm:$0xff] }
  0x9a   :  { %788 = vrot.lane.b32.xlu0 %v397_v1, %s2941_s30 }
  0x9b   :  { %v711_v7 = vpop.permute.xlu1 %710 }
  0x9c   :  { %v649_v8 = vpop.permute.xlu0 %648  ;;  %v1017_v31 = vsel %vm1016_vm6, %v1000_v30, %v711_v7 }
  0x9d   :  { %662 = vrot.lane.b32.xlu1 %v318_v56, %s2939_s19  ;;  %v1001_v44 = vsel %vm999_vm5, %v984_v3, %v649_v8  ;;  %v324_v3 = vld [vmem:[#allocation2 + $0x111] sm:$0xff] }
  0x9e   :  { %600 = vrot.lane.b32.xlu0 %v3390_v6, %s2938_s29 }
  0x9f   :  { %v3395_v10 = vpop.permute.xlu1 %522 }
  0xa0   :  { %v3397_v11 = vpop.permute.xlu0 %460  ;;  %v968_v7 = vsel %vm234_vm0, %v952_v4, %v3395_v10  ;;  %v338_v10 = vld [vmem:[#allocation2 + $0xf2] sm:$0xff] }
  0xa1   :  { %914 = vrot.lane.b32.xlu1 %v380_v57, %s2943_s1 }
  0xa2   :  { %852 = vrot.lane.b32.xlu0 %v413_v9, %s2942_s27 }
  0xa3   :  { %v775_v13 = vpop.permute.xlu1 %774 }
  0xa4   :  { %v713_v14 = vpop.permute.xlu0 %712  ;;  %v1034_v32 = vsel %vm1033_vm7, %v1017_v31, %v775_v13 }
  0xa5   :  { %664 = vrot.lane.b32.xlu1 %v366_v12, %s2939_s19  ;;  %v1018_v46 = vsel %vm1016_vm6, %v1001_v44, %v713_v14 }
  0xa6   :  { %474 = vrot.lane.b32.xlu0 %v366_v12, %s2937_s13 }
  0xa7   :  { %v3403_v16 = vpop.permute.xlu1 %586 }
  0xa8   :  { %v3405_v17 = vpop.permute.xlu0 %524  ;;  %v985_v8 = vsel %vm982_vm4, %v968_v7, %v3403_v16 }
  0xa9   :  { %916 = vrot.lane.b32.xlu1 %v429_v15, %s2943_s1 }
  0xaa   :  { %726 = vrot.lane.b32.xlu0 %v334_v61, %s2940_s28  ;;  %v337_v61 = vld [vmem:[#allocation2 + $0xe2] sm:$0xff] }
  0xab   :  { %v839_v23 = vpop.permute.xlu1 %838 }
  0xac   :  { %v777_v24 = vpop.permute.xlu0 %776  ;;  %v1051_v36 = vsel %vm1050_vm8, %v1034_v32, %v839_v23 }
  0xad   :  { %538 = vrot.lane.b32.xlu1 %v335_v20, %s2936_s12  ;;  %v1035_v47 = vsel %vm1033_vm7, %v1018_v46, %v777_v24 }
  0xae   :  { %476 = vrot.lane.b32.xlu0 %v320_v21, %s2937_s13 }
  0xaf   :  { %v651_v28 = vpop.permute.xlu1 %650 }
  0xb0   :  { %v3414_v29 = vpop.permute.xlu0 %588  ;;  %v1002_v13 = vsel %vm999_vm5, %v985_v8, %v651_v28 }
  0xb1   :  { %790 = vrot.lane.b32.xlu1 %v3390_v6, %s2941_s30 }
  0xb2   :  { %728 = vrot.lane.b32.xlu0 %v335_v20, %s2940_s28 }
  0xb3   :  { %v903_v37 = vpop.permute.xlu1 %902 }
  0xb4   :  { %v841_v38 = vpop.permute.xlu0 %840  ;;  %v1068_v39 = vsel %vm1067_vm9, %v1051_v36, %v903_v37 }
  0xb5   :  { %602 = vrot.lane.b32.xlu1 %v3422_v33, %s2938_s29  ;;  %2817 = vmatprep.mubr.msk.f32.mxu0 %vm1089_vm10, %v1068_v39  ;;  %v1052_v49 = vsel %vm1050_vm8, %v1035_v47, %v841_v38 }
  0xb6   :  { %540 = vrot.lane.b32.xlu0 %v336_v34, %s2936_s12 }
  0xb7   :  { %v653_v41 = vpop.permute.xlu1 %652 }
  0xb8   :  { %v3436_v42 = vpop.permute.xlu0 %462 }
  0xb9   :  { %854 = vrot.lane.b32.xlu1 %v366_v12, %s2942_s27  ;;  %v954_v46 = vsel %vm185_vm2, %v3257_v63, %v3436_v42  ;;  %v3545_v42 = vld [vmem:[#allocation2 + $0x110] sm:$0xff] }
  0xba   :  { %792 = vrot.lane.b32.xlu0 %v3422_v33, %s2941_s30 }
  0xbb   :  { %v905_v50 = vpop.permute.xlu1 %904 }
  0xbc   :  { %v715_v51 = vpop.permute.xlu0 %714  ;;  %v1069_v52 = vsel %vm1067_vm9, %v1052_v49, %v905_v50 }
  0xbd   :  { %666 = vrot.lane.b32.xlu1 %v320_v21, %s2939_s19  ;;  %2818 = vmatmul.mubr.msk.f32.vlgmr.msra.gmra.mrb[0].mxu0 %vm1089_vm10, %v1069_v52  ;;  %v1019_v14 = vsel %vm1016_vm6, %v1002_v13, %v715_v51 }
  0xbe   :  { %604 = vrot.lane.b32.xlu0 %v3444_v48, %s2938_s29 }
  0xbf   :  { %v3452_v53 = vpop.permute.xlu1 %526 }
  0xc0   :  { %v3454_v54 = vpop.permute.xlu0 %464  ;;  %v970_v47 = vsel %vm234_vm0, %v954_v46, %v3452_v53  ;;  %v340_v53 = vld [vmem:[#allocation2 + $0x112] sm:$0xff] }
  0xc1   :  { %918 = vrot.lane.b32.xlu1 %v335_v20, %s2943_s1 }
  0xc2   :  { %856 = vrot.lane.b32.xlu0 %v320_v21, %s2942_s27  ;;  %v953_v21 = vsel %vm185_vm2, %v3215_v45, %v3397_v11 }
  0xc3   :  { %v779_v56 = vpop.permute.xlu1 %778  ;;  %v969_v22 = vsel %vm234_vm0, %v953_v21, %v3405_v17  ;;  %v3506_v17 = vld [vmem:[#allocation2 + $0x100] sm:$0xff] }
  0xc4   :  { %v717_v57 = vpop.permute.xlu0 %716  ;;  %v1036_v5 = vsel %vm1033_vm7, %v1019_v14, %v779_v56  ;;  %v986_v23 = vsel %vm982_vm4, %v969_v22, %v3414_v29 }
  0xc5   :  { %668 = vrot.lane.b32.xlu1 %v368_v55, %s2939_s19  ;;  %v1003_v27 = vsel %vm999_vm5, %v986_v23, %v653_v41  ;;  %v405_v23 = vld [vmem:[#allocation2 + $0x130] sm:$0xff] }
  0xc6   :  { %478 = vrot.lane.b32.xlu0 %v368_v55, %s2937_s13  ;;  %v1020_v45 = vsel %vm1016_vm6, %v1003_v27, %v717_v57 }
  0xc7   :  { %v3460_v58 = vpop.permute.xlu1 %590 }
  0xc8   :  { %v3462_v59 = vpop.permute.xlu0 %528  ;;  %v987_v49 = vsel %vm982_vm4, %v970_v47, %v3460_v58 }
  0xc9   :  { %920 = vrot.lane.b32.xlu1 %v336_v34, %s2943_s1 }
  0xca   :  { %730 = vrot.lane.b32.xlu0 %v336_v34, %s2940_s28 }
  0xcb   :  { %v843_v0 = vpop.permute.xlu1 %842 }
  0xcc   :  { %v781_v1 = vpop.permute.xlu0 %780  ;;  %v1053_v15 = vsel %vm1050_vm8, %v1036_v5, %v843_v0 }
  0xcd   :  { %542 = vrot.lane.b32.xlu1 %v337_v61, %s2936_s12  ;;  %v1037_v11 = vsel %vm1033_vm7, %v1020_v45, %v781_v1 }
  0xce   :  { %480 = vrot.lane.b32.xlu0 %v322_v62, %s2937_s13 }
  0xcf   :  { %v655_v9 = vpop.permute.xlu1 %654 }
  0xd0   :  { %v3475_v12 = vpop.permute.xlu0 %592  ;;  %v1004_v52 = vsel %vm999_vm5, %v987_v49, %v655_v9 }
  0xd1   :  { %794 = vrot.lane.b32.xlu1 %v3444_v48, %s2941_s30 }
  0xd2   :  { %732 = vrot.lane.b32.xlu0 %v337_v61, %s2940_s28 }
  0xd3   :  { %v907_v16 = vpop.permute.xlu1 %906 }
  0xd4   :  { %v845_v18 = vpop.permute.xlu0 %844  ;;  %v1070_v20 = vsel %vm1067_vm9, %v1053_v15, %v907_v16  ;;  %v372_v15 = vld [vmem:[#allocation2 + $0x121] sm:$0xff] }
  0xd5   :  { %606 = vrot.lane.b32.xlu1 %v3483_v2, %s2938_s29  ;;  %2820 = vmatprep.mubr.msk.f32.mxu0 %vm1089_vm10, %v1070_v20  ;;  %v1054_v28 = vsel %vm1050_vm8, %v1037_v11, %v845_v18  ;;  %v388_v20 = vld [vmem:[#allocation2 + $0x122] sm:$0xff] }
  0xd6   :  { %544 = vrot.lane.b32.xlu0 %v338_v10, %s2936_s12 }
  0xd7   :  { %v657_v24 = vpop.permute.xlu1 %656 }
  0xd8   :  { %v3498_v26 = vpop.permute.xlu0 %466 }
  0xd9   :  { %858 = vrot.lane.b32.xlu1 %v368_v55, %s2942_s27  ;;  %v956_v45 = vsel %vm185_vm2, %v3311_v25, %v3498_v26  ;;  %v437_v26 = vld [vmem:[#allocation2 + $0x132] sm:$0xff] }
  0xda   :  { %796 = vrot.lane.b32.xlu0 %v3483_v2, %s2941_s30 }
  0xdb   :  { %v909_v30 = vpop.permute.xlu1 %908 }
  0xdc   :  { %v719_v29 = vpop.permute.xlu0 %718  ;;  %v1071_v31 = vsel %vm1067_vm9, %v1054_v28, %v909_v30  ;;  %v421_v28 = vld [vmem:[#allocation2 + $0x131] sm:$0xff] }
  0xdd   :  { %670 = vrot.lane.b32.xlu1 %v322_v62, %s2939_s19  ;;  %2821 = vmatmul.mubr.msk.f32.gmra.mrb[2].mxu0 %vm1089_vm10, %v1071_v31  ;;  %v1021_v55 = vsel %vm1016_vm6, %v1004_v52, %v719_v29 }
  0xde   :  { %608 = vrot.lane.b32.xlu0 %v3506_v17, %s2938_s29 }
  0xdf   :  { %v3514_v32 = vpop.permute.xlu1 %530 }
  0xe0   :  { %v3516_v34 = vpop.permute.xlu0 %468  ;;  %v972_v11 = vsel %vm234_vm0, %v956_v45, %v3514_v32 }
  0xe1   :  { %922 = vrot.lane.b32.xlu1 %v337_v61, %s2943_s1 }
  0xe2   :  { %860 = vrot.lane.b32.xlu0 %v322_v62, %s2942_s27  ;;  %v955_v62 = vsel %vm185_vm2, %v3300_v19, %v3454_v54 }
  0xe3   :  { %v783_v36 = vpop.permute.xlu1 %782  ;;  %v971_v0 = vsel %vm234_vm0, %v955_v62, %v3462_v59  ;;  %v356_v59 = vld [vmem:[#allocation2 + $0x120] sm:$0xff] }
  0xe4   :  { %v721_v37 = vpop.permute.xlu0 %720  ;;  %v1038_v63 = vsel %vm1033_vm7, %v1021_v55, %v783_v36  ;;  %v988_v1 = vsel %vm982_vm4, %v971_v0, %v3475_v12 }
  0xe5   :  { %672 = vrot.lane.b32.xlu1 %v370_v35, %s2939_s19  ;;  %v1005_v8 = vsel %vm999_vm5, %v988_v1, %v657_v24 }
  0xe6   :  { %482 = vrot.lane.b32.xlu0 %v370_v35, %s2937_s13  ;;  %v1022_v19 = vsel %vm1016_vm6, %v1005_v8, %v721_v37 }
  0xe7   :  { %v3522_v38 = vpop.permute.xlu1 %594 }
  0xe8   :  { %v3524_v39 = vpop.permute.xlu0 %532  ;;  %v989_v30 = vsel %vm982_vm4, %v972_v11, %v3522_v38  ;;  %v957_v38 = vsel %vm185_vm2, %v3354_v43, %v3516_v34 }
  0xe9   :  { %924 = vrot.lane.b32.xlu1 %v338_v10, %s2943_s1 }
  0xea   :  { %734 = vrot.lane.b32.xlu0 %v338_v10, %s2940_s28 }
  0xeb   :  { %v847_v41 = vpop.permute.xlu1 %846 }
  0xec   :  { %v785_v44 = vpop.permute.xlu0 %784  ;;  %v1055_v56 = vsel %vm1050_vm8, %v1038_v63, %v847_v41  ;;  %v973_v41 = vsel %vm234_vm0, %v957_v38, %v3524_v39 }
  0xed   :  { %546 = vrot.lane.b32.xlu1 %v339_v40, %s2936_s12  ;;  %v1039_v54 = vsel %vm1033_vm7, %v1022_v19, %v785_v44 }
  0xee   :  { %484 = vrot.lane.b32.xlu0 %v324_v3, %s2937_s13  ;;  %s2945_s13 = smov 64  }
  0xef   :  { %v659_v50 = vpop.permute.xlu1 %658 }
  0xf0   :  { %v3537_v51 = vpop.permute.xlu0 %596 }
  0xf1   :  { %798 = vrot.lane.b32.xlu1 %v3506_v17, %s2941_s30  ;;  %v990_v44 = vsel %vm982_vm4, %v973_v41, %v3537_v51 }
  0xf2   :  { %736 = vrot.lane.b32.xlu0 %v339_v40, %s2940_s28 }
  0xf3   :  { %v911_v57 = vpop.permute.xlu1 %910 }
  0xf4   :  { %v849_v58 = vpop.permute.xlu0 %848  ;;  %v1072_v61 = vsel %vm1067_vm9, %v1055_v56, %v911_v57 }
  0xf5   :  { %610 = vrot.lane.b32.xlu1 %v3545_v42, %s2938_s29  ;;  %2823 = vmatprep.mubr.msk.f32.mxu0 %vm1089_vm10, %v1072_v61  ;;  %v1056_v9 = vsel %vm1050_vm8, %v1039_v54, %v849_v58  ;;  %v301_v61 = vld [vmem:[#allocation2 + $0xa0] sm:$0xff] }
  0xf6   :  { %548 = vrot.lane.b32.xlu0 %v340_v53, %s2936_s12 }
  0xf7   :  { %v661_v4 = vpop.permute.xlu1 %660 }
  0xf8   :  { %v3560_v7 = vpop.permute.xlu0 %470  ;;  %v1007_v49 = vsel %vm999_vm5, %v990_v44, %v661_v4 }
  0xf9   :  { %862 = vrot.lane.b32.xlu1 %v370_v35, %s2942_s27  ;;  %v1006_v35 = vsel %vm999_vm5, %v989_v30, %v659_v50  ;;  %v958_v1 = vsel %vm185_vm2, %v301_v61, %v3560_v7 }
  0xfa   :  { %800 = vrot.lane.b32.xlu0 %v3545_v42, %s2941_s30 }
  0xfb   :  { %v913_v13 = vpop.permute.xlu1 %912 }
  0xfc   :  { %v723_v14 = vpop.permute.xlu0 %722  ;;  %v1073_v12 = vsel %vm1067_vm9, %v1056_v9, %v913_v13 }
  0xfd   :  { %674 = vrot.lane.b32.xlu1 %v324_v3, %s2939_s19  ;;  %2824 = vmatmul.mubr.msk.f32.gmra.mrb[4].mxu0 %vm1089_vm10, %v1073_v12  ;;  %v1023_v36 = vsel %vm1016_vm6, %v1006_v35, %v723_v14 }
  0xfe   :  { %612 = vrot.lane.b32.xlu0 %v356_v59, %s2938_s29  ;;  %s2946_s29 = smov 56  }
  0xff   :  { %v535_v5 = vpop.permute.xlu1 %534 }
 0x100   :  { %v3573_v10 = vpop.permute.xlu0 %472  ;;  %v974_v4 = vsel %vm234_vm0, %v958_v1, %v535_v5 }
 0x101   :  { %926 = vrot.lane.b32.xlu1 %v339_v40, %s2943_s1  ;;  %v959_v7 = vsel %vm185_vm2, %v3379_v60, %v3573_v10 }
 0x102   :  { %864 = vrot.lane.b32.xlu0 %v324_v3, %s2942_s27 }
 0x103   :  { %v787_v16 = vpop.permute.xlu1 %786 }
 0x104   :  { %v725_v18 = vpop.permute.xlu0 %724  ;;  %v1040_v25 = vsel %vm1033_vm7, %v1023_v36, %v787_v16 }
 0x105   :  { %738 = vrot.lane.b32.xlu1 %v340_v53, %s2940_s28  ;;  %v1024_v50 = vsel %vm1016_vm6, %v1007_v49, %v725_v18 }
 0x106   :  { %676 = vrot.lane.b32.xlu0 %v372_v15, %s2939_s19 }
 0x107   :  { %v599_v21 = vpop.permute.xlu1 %598 }
 0x108   :  { %v3579_v22 = vpop.permute.xlu0 %536  ;;  %v991_v8 = vsel %vm982_vm4, %v974_v4, %v599_v21 }
 0x109   :  { %740 = vrot.lane.b32.xlu1 %v388_v20, %s2940_s28  ;;  %v975_v5 = vsel %vm234_vm0, %v959_v7, %v3579_v22 }
 0x10a   :  { %928 = vrot.lane.b32.xlu0 %v340_v53, %s2943_s1 }
 0x10b   :  { %v851_v24 = vpop.permute.xlu1 %850 }
 0x10c   :  { %v789_v27 = vpop.permute.xlu0 %788  ;;  %v1057_v37 = vsel %vm1050_vm8, %v1040_v25, %v851_v24 }
 0x10d   :  { %804 = vrot.lane.b32.xlu1 %v405_v23, %s2941_s30  ;;  %v1041_v43 = vsel %vm1033_vm7, %v1024_v50, %v789_v27 }
 0x10e   :  { %802 = vrot.lane.b32.xlu0 %v356_v59, %s2941_s30 }
 0x10f   :  { %v663_v29 = vpop.permute.xlu1 %662 }
 0x110   :  { %v601_v31 = vpop.permute.xlu0 %600  ;;  %v1008_v59 = vsel %vm999_vm5, %v991_v8, %v663_v29 }
 0x111   :  { %868 = vrot.lane.b32.xlu1 %v421_v28, %s2942_s27  ;;  %v992_v18 = vsel %vm982_vm4, %v975_v5, %v601_v31 }
 0x112   :  { %866 = vrot.lane.b32.xlu0 %v372_v15, %s2942_s27 }
 0x113   :  { %v915_v32 = vpop.permute.xlu1 %914 }
 0x114   :  { %v853_v40 = vpop.permute.xlu0 %852  ;;  %v1074_v3 = vsel %vm1067_vm9, %v1057_v37, %v915_v32 }
 0x115   :  { %932 = vrot.lane.b32.xlu1 %v437_v26, %s2943_s1  ;;  %2826 = vmatprep.mubr.msk.f32.mxu0 %vm1089_vm10, %v1074_v3  ;;  %v1058_v34 = vsel %vm1050_vm8, %v1041_v43, %v853_v40 }
 0x116   :  { %930 = vrot.lane.b32.xlu0 %v388_v20, %s2943_s1 }
 0x117   :  { %v665_v46 = vpop.permute.xlu1 %664 }
 0x118   :  { %v475_v47 = vpop.permute.xlu0 %474  ;;  %v1009_v23 = vsel %vm999_vm5, %v992_v18, %v665_v46 }
 0x119   :  { %v960_v26 = vsel %vm185_vm2, %v3390_v6, %v475_v47 }
 0x11b   :  { %v917_v52 = vpop.permute.xlu1 %916 }
 0x11c   :  { %v727_v55 = vpop.permute.xlu0 %726  ;;  %v1075_v63 = vsel %vm1067_vm9, %v1058_v34, %v917_v52 }
 0x11d   :  { %2827 = vmatmul.mubr.msk.f32.gmra.mrb[6].mxu0 %vm1089_vm10, %v1075_v63  ;;  %v1025_v9 = vsel %vm1016_vm6, %v1008_v59, %v727_v55 }
 0x11f   :  { %v539_v39 = vpop.permute.xlu1 %538 }
 0x120   :  { %v477_v53 = vpop.permute.xlu0 %476  ;;  %v976_v37 = vsel %vm234_vm0, %v960_v26, %v539_v39 }
 0x121   :  { %v961_v6 = vsel %vm185_vm2, %v3422_v33, %v477_v53 }
 0x123   :  { %v791_v56 = vpop.permute.xlu1 %790 }
 0x124   :  { %v729_v51 = vpop.permute.xlu0 %728  ;;  %v1042_v13 = vsel %vm1033_vm7, %v1025_v9, %v791_v56 }
 0x125   :  { %v1026_v24 = vsel %vm1016_vm6, %v1009_v23, %v729_v51 }
 0x127   :  { %v603_v57 = vpop.permute.xlu1 %602 }
 0x128   :  { %v541_v58 = vpop.permute.xlu0 %540  ;;  %v993_v32 = vsel %vm982_vm4, %v976_v37, %v603_v57 }
 0x129   :  { %v977_v47 = vsel %vm234_vm0, %v961_v6, %v541_v58 }
 0x12b   :  { %v855_v62 = vpop.permute.xlu1 %854 }
 0x12c   :  { %v793_v0 = vpop.permute.xlu0 %792  ;;  %v1059_v14 = vsel %vm1050_vm8, %v1042_v13, %v855_v62 }
 0x12d   :  { %v1043_v27 = vsel %vm1033_vm7, %v1026_v24, %v793_v0 }
 0x12f   :  { %v667_v19 = vpop.permute.xlu1 %666 }
 0x130   :  { %v605_v54 = vpop.permute.xlu0 %604  ;;  %v1010_v38 = vsel %vm999_vm5, %v993_v32, %v667_v19 }
 0x131   :  { %v994_v34 = vsel %vm982_vm4, %v977_v47, %v605_v54 }
 0x133   :  { %v919_v12 = vpop.permute.xlu1 %918 }
 0x134   :  { %v857_v15 = vpop.permute.xlu0 %856  ;;  %v1076_v16 = vsel %vm1067_vm9, %v1059_v14, %v919_v12 }
 0x135   :  { %2829 = vmatprep.mubr.msk.f32.mxu0 %vm1089_vm10, %v1076_v16  ;;  %v1060_v45 = vsel %vm1050_vm8, %v1043_v27, %v857_v15 }
 0x137   :  { %v669_v20 = vpop.permute.xlu1 %668 }
 0x138   :  { %v479_v21 = vpop.permute.xlu0 %478  ;;  %v1011_v63 = vsel %vm999_vm5, %v994_v34, %v669_v20 }
 0x139   :  { %v962_v54 = vsel %vm185_vm2, %v3444_v48, %v479_v21 }
 0x13b   :  { %v921_v11 = vpop.permute.xlu1 %920 }
 0x13c   :  { %v731_v28 = vpop.permute.xlu0 %730  ;;  %v1077_v60 = vsel %vm1067_vm9, %v1060_v45, %v921_v11 }
 0x13d   :  { %2830 = vmatmul.mubr.msk.f32.gmra.mrb[8].mxu0 %vm1089_vm10, %v1077_v60  ;;  %v1027_v41 = vsel %vm1016_vm6, %v1010_v38, %v731_v28 }
 0x13f   :  { %v543_v10 = vpop.permute.xlu1 %542 }
 0x140   :  { %v481_v22 = vpop.permute.xlu0 %480  ;;  %v978_v59 = vsel %vm234_vm0, %v962_v54, %v543_v10 }
 0x141   :  { %v963_v48 = vsel %vm185_vm2, %v3483_v2, %v481_v22 }
 0x143   :  { %v795_v30 = vpop.permute.xlu1 %794 }
 0x144   :  { %v733_v29 = vpop.permute.xlu0 %732  ;;  %v1044_v44 = vsel %vm1033_vm7, %v1027_v41, %v795_v30 }
 0x145   :  { %v1028_v39 = vsel %vm1016_vm6, %v1011_v63, %v733_v29 }
 0x147   :  { %v607_v31 = vpop.permute.xlu1 %606 }
 0x148   :  { %v545_v35 = vpop.permute.xlu0 %544  ;;  %v995_v9 = vsel %vm982_vm4, %v978_v59, %v607_v31 }
 0x149   :  { %v979_v21 = vsel %vm234_vm0, %v963_v48, %v545_v35 }
 0x14b   :  { %v859_v36 = vpop.permute.xlu1 %858 }
 0x14c   :  { %v797_v25 = vpop.permute.xlu0 %796  ;;  %v1061_v46 = vsel %vm1050_vm8, %v1044_v44, %v859_v36 }
 0x14d   :  { %v1045_v56 = vsel %vm1033_vm7, %v1028_v39, %v797_v25 }
 0x14f   :  { %v671_v40 = vpop.permute.xlu1 %670 }
 0x150   :  { %v609_v3 = vpop.permute.xlu0 %608  ;;  %v1012_v12 = vsel %vm999_vm5, %v995_v9, %v671_v40 }
 0x151   :  { %v996_v23 = vsel %vm982_vm4, %v979_v21, %v609_v3 }
 0x153   :  { %v923_v49 = vpop.permute.xlu1 %922 }
 0x154   :  { %v861_v50 = vpop.permute.xlu0 %860  ;;  %v1078_v43 = vsel %vm1067_vm9, %v1061_v46, %v923_v49 }
 0x155   :  { %2832 = vmatprep.mubr.msk.f32.mxu0 %vm1089_vm10, %v1078_v43  ;;  %v1062_v51 = vsel %vm1050_vm8, %v1045_v56, %v861_v50 }
 0x157   :  { %v673_v52 = vpop.permute.xlu1 %672 }
 0x158   :  { %v483_v55 = vpop.permute.xlu0 %482  ;;  %v1013_v45 = vsel %vm999_vm5, %v996_v23, %v673_v52 }
 0x159   :  { %v964_v31 = vsel %vm185_vm2, %v3506_v17, %v483_v55 }
 0x15b   :  { %v925_v57 = vpop.permute.xlu1 %924 }
 0x15c   :  { %v735_v61 = vpop.permute.xlu0 %734  ;;  %v1079_v33 = vsel %vm1067_vm9, %v1062_v51, %v925_v57 }
 0x15d   :  { %2833 = vmatmul.mubr.msk.f32.gmra.mrb[10].mxu0 %vm1089_vm10, %v1079_v33  ;;  %v1029_v15 = vsel %vm1016_vm6, %v1012_v12, %v735_v61 }
 0x15f   :  { %v547_v53 = vpop.permute.xlu1 %546 }
 0x160   :  { %v485_v58 = vpop.permute.xlu0 %484  ;;  %v980_v36 = vsel %vm234_vm0, %v964_v31, %v547_v53 }
 0x161   :  { %v965_v35 = vsel %vm185_vm2, %v3545_v42, %v485_v58 }
 0x163   :  { %v799_v62 = vpop.permute.xlu1 %798 }
 0x164   :  { %v737_v0 = vpop.permute.xlu0 %736  ;;  %v1046_v16 = vsel %vm1033_vm7, %v1029_v15, %v799_v62 }
 0x165   :  { %v1030_v11 = vsel %vm1016_vm6, %v1013_v45, %v737_v0  ;;  %v1495_v45 = vld [vmem:[#allocation2 + $0x1] sm:$0xff] }
 0x166   :  { %1639 = vrot.lane.b32.xlu0 %v1495_v45, %s2936_s12 }
 0x167   :  { %v611_v1 = vpop.permute.xlu1 %610 }
 0x168   :  { %v549_v4 = vpop.permute.xlu0 %548  ;;  %v997_v26 = vsel %vm982_vm4, %v980_v36, %v611_v1 }
 0x169   :  { %v981_v25 = vsel %vm234_vm0, %v965_v35, %v549_v4 }
 0x16b   :  { %v863_v8 = vpop.permute.xlu1 %862 }
 0x16c   :  { %v801_v19 = vpop.permute.xlu0 %800  ;;  %v1063_v7 = vsel %vm1050_vm8, %v1046_v16, %v863_v8 }
 0x16d   :  { %v1047_v28 = vsel %vm1033_vm7, %v1030_v11, %v801_v19  ;;  %v1511_v11 = vld [vmem:[#allocation2 + $0x2] sm:$0xff] }
 0x16e   :  { %1703 = vrot.lane.b32.xlu0 %v1511_v11, %s2939_s19 }
 0x16f   :  { %v675_v13 = vpop.permute.xlu1 %674 }
 0x170   :  { %v613_v14 = vpop.permute.xlu0 %612  ;;  %v1014_v3 = vsel %vm999_vm5, %v997_v26, %v675_v13 }
 0x171   :  { %v998_v37 = vsel %vm982_vm4, %v981_v25, %v613_v14 }
 0x173   :  { %v927_v5 = vpop.permute.xlu1 %926 }
 0x174   :  { %v865_v18 = vpop.permute.xlu0 %864  ;;  %v1080_v20 = vsel %vm1067_vm9, %v1063_v7, %v927_v5 }
 0x175   :  { %2835 = vmatprep.mubr.msk.f32.mxu0 %vm1089_vm10, %v1080_v20  ;;  %v1064_v60 = vsel %vm1050_vm8, %v1047_v28, %v865_v18  ;;  %v1503_v28 = vld [vmem:[#allocation2 + $0xa1] sm:$0xff] }
 0x176   :  { %1655 = vrot.lane.b32.xlu0 %v1503_v28, %s2936_s12 }
 0x177   :  { %v739_v24 = vpop.permute.xlu1 %738 }
 0x178   :  { %v677_v27 = vpop.permute.xlu0 %676  ;;  %v1031_v41 = vsel %vm1016_vm6, %v1014_v3, %v739_v24 }
 0x179   :  { %v1015_v38 = vsel %vm999_vm5, %v998_v37, %v677_v27 }
 0x17b   :  { %v741_v10 = vpop.permute.xlu1 %740 }
 0x17c   :  { %v929_v30 = vpop.permute.xlu0 %928  ;;  %v1032_v17 = vsel %vm1016_vm6, %v1015_v38, %v741_v10  ;;  %v1582_v10 = vld [vmem:[#allocation2 + $0x90] sm:$0xff] }
 0x17d   :  { %v1081_v2 = vsel %vm1067_vm9, %v1064_v60, %v929_v30  ;;  %v1519_v60 = vld [vmem:[#allocation2 + $0xa2] sm:$0xff]  ;;  %v1614_v30 = vld [vmem:[#allocation2 + $0x92] sm:$0xff]  ;;  %1973 = vrot.lane.b32.xlu0 %v1582_v10, %s2944_s0 }
 0x17e   :  { %2836 = vmatmul.mubr.msk.f32.gmra.mrb[12].mxu0 %vm1089_vm10, %v1081_v2  ;;  %1719 = vrot.lane.b32.xlu1 %v1519_v60, %s2939_s19  ;;  %v1598_v2 = vld [vmem:[#allocation2 + $0x91] sm:$0xff] }
 0x17f   :  { %v805_v22 = vpop.permute.xlu1 %804 }
 0x180   :  { %v803_v29 = vpop.permute.xlu0 %802  ;;  %v1049_v42 = vsel %vm1033_vm7, %v1032_v17, %v805_v22 }
 0x181   :  { %v1048_v44 = vsel %vm1033_vm7, %v1031_v41, %v803_v29  ;;  %2037 = vrot.lane.b32.xlu0 %v1598_v2, %s2946_s29 }
 0x182   :  { %2101 = vrot.lane.b32.xlu1 %v1614_v30, %s2945_s13 }
 0x183   :  { %v869_v32 = vpop.permute.xlu1 %868 }
 0x184   :  { %v867_v40 = vpop.permute.xlu0 %866  ;;  %v1066_v46 = vsel %vm1050_vm8, %v1049_v42, %v869_v32 }
 0x185   :  { %v1065_v49 = vsel %vm1050_vm8, %v1048_v44, %v867_v40 }
 0x187   :  { %v933_v50 = vpop.permute.xlu1 %932 }
 0x188   :  { %v931_v43 = vpop.permute.xlu0 %930  ;;  %v1083_v6 = vsel %vm1067_vm9, %v1066_v46, %v933_v50 }
 0x189   :  { %v1082_v47 = vsel %vm1067_vm9, %v1065_v49, %v931_v43 }
 0x18a   :  { %2838 = vmatprep.mubr.msk.f32.mxu0 %vm1089_vm10, %v1082_v47 }
 0x18b   :  { %2839 = vmatmul.mubr.msk.f32.gmra.mrb[14].mxu0 %vm1089_vm10, %v1083_v6 }
 0x190   :  { %v3697_v34 = vpop.f32.mrb[0].mxu0 }
 0x191   :  { %v1288_v52 = vsel %vm234_vm0, %v3697_v34, 0.0  ;;  %v3701_v55 = vpop.f32.mrb[1].mxu0 }
 0x192   :  { %v1287_v63 = vsel %vm234_vm0, %v3701_v55, 0.0 }
 0x193   :  { %v1289_v39 = vadd.f32 %v1288_v52, %v1287_v63 }
 0x1b0   :  { %v3705_v56 = vpop.f32.mrb[2].mxu0 }
 0x1b1   :  { %v3707_v51 = vpop.f32.mrb[3].mxu0  ;;  %v1292_v33 = vsel %vm234_vm0, %v3705_v56, 0.0 }
 0x1b2   :  { %v1290_v57 = vsel %vm234_vm0, %v3707_v51, 0.0 }
 0x1b3   :  { %v1291_v61 = vadd.f32 %v1290_v57, %v1289_v39 }
 0x1b5   :  { %v1293_v53 = vadd.f32 %v1292_v33, %v1291_v61 }
 0x1d0   :  { %v3713_v58 = vpop.f32.mrb[4].mxu0 }
 0x1d1   :  { %v3715_v62 = vpop.f32.mrb[5].mxu0  ;;  %v1296_v4 = vsel %vm234_vm0, %v3713_v58, 0.0 }
 0x1d2   :  { %v1294_v0 = vsel %vm234_vm0, %v3715_v62, 0.0 }
 0x1d3   :  { %v1295_v1 = vadd.f32 %v1294_v0, %v1293_v53 }
 0x1d5   :  { %v1297_v8 = vadd.f32 %v1296_v4, %v1295_v1 }
 0x1f0   :  { %v3721_v19 = vpop.f32.mrb[6].mxu0 }
 0x1f1   :  { %v3723_v54 = vpop.f32.mrb[7].mxu0  ;;  %v1300_v13 = vsel %vm234_vm0, %v3721_v19, 0.0 }
 0x1f2   :  { %v1298_v59 = vsel %vm234_vm0, %v3723_v54, 0.0 }
 0x1f3   :  { %v1299_v9 = vadd.f32 %v1298_v59, %v1297_v8 }
 0x1f5   :  { %v1301_v14 = vadd.f32 %v1300_v13, %v1299_v9 }
 0x210   :  { %v3729_v12 = vpop.f32.mrb[8].mxu0 }
 0x211   :  { %v3731_v15 = vpop.f32.mrb[9].mxu0  ;;  %v1304_v5 = vsel %vm234_vm0, %v3729_v12, 0.0 }
 0x212   :  { %v1302_v16 = vsel %vm234_vm0, %v3731_v15, 0.0 }
 0x213   :  { %v1303_v7 = vadd.f32 %v1302_v16, %v1301_v14 }
 0x215   :  { %v1305_v18 = vadd.f32 %v1304_v5, %v1303_v7 }
 0x230   :  { %v3737_v20 = vpop.f32.mrb[10].mxu0 }
 0x231   :  { %v3739_v48 = vpop.f32.mrb[11].mxu0  ;;  %v1308_v24 = vsel %vm234_vm0, %v3737_v20, 0.0 }
 0x232   :  { %v1306_v21 = vsel %vm234_vm0, %v3739_v48, 0.0 }
 0x233   :  { %v1307_v23 = vadd.f32 %v1306_v21, %v1305_v18 }
 0x235   :  { %v1309_v27 = vadd.f32 %v1308_v24, %v1307_v23 }
 0x251   :  { %v3752_v22 = vpop.f32.mrb[12].mxu0 }
 0x252   :  { %v3754_v29 = vpop.f32.mrb[13].mxu0  ;;  %v1312_v36 = vsel %vm234_vm0, %v3752_v22, 0.0 }
 0x253   :  { %v1310_v31 = vsel %vm234_vm0, %v3754_v29, 0.0 }
 0x254   :  { %v1311_v35 = vadd.f32 %v1310_v31, %v1309_v27 }
 0x256   :  { %v1313_v25 = vadd.f32 %v1312_v36, %v1311_v35 }
 0x25e   :  { %v3760_v26 = vpop.f32.mrb[14].mxu0 }
 0x25f   :  { %v3762_v37 = vpop.f32.mrb[15].mxu0  ;;  %v1316_v3 = vsel %vm234_vm0, %v3760_v26, 0.0 }
 0x260   :  { %v1314_v32 = vsel %vm234_vm0, %v3762_v37, 0.0 }
 0x261   :  { %v1315_v40 = vadd.f32 %v1314_v32, %v1313_v25 }
 0x263   :  { %v1317_v38 = vadd.f32 %v1316_v3, %v1315_v40 }
 0x265   :  { %v1318_v41 = vrot.slane %v1317_v38, 4 }
 0x267   :  { %v1319_v17 = vadd.f32 %v1318_v41, %v1317_v38 }
 0x269   :  { %v1320_v42 = vrot.slane %v1319_v17, 2 }
 0x26b   :  { %v1321_v44 = vadd.f32 %v1320_v42, %v1319_v17 }
 0x26d   :  { %v1322_v46 = vrot.slane %v1321_v44, 1 }
 0x26f   :  { %v1323_v49 = vadd.f32 %v1322_v46, %v1321_v44 }
 0x271   :  { %v3768_v50 = vmul.f32 0.0078125, %v1323_v49 }
 0x273   :  { %v1326_v43 = vsub.f32 %v3701_v55, %v3768_v50  ;;  %v1327_v6 = vsub.f32 %v3697_v34, %v3768_v50  ;;  %v1328_v47 = vsub.f32 %v3707_v51, %v3768_v50  ;;  %v1329_v52 = vsub.f32 %v3705_v56, %v3768_v50 }
 0x274   :  { %v1330_v63 = vsub.f32 %v3715_v62, %v3768_v50  ;;  %v1331_v39 = vsub.f32 %v3713_v58, %v3768_v50  ;;  %v1332_v57 = vsub.f32 %v3723_v54, %v3768_v50  ;;  %v1333_v61 = vsub.f32 %v3721_v19, %v3768_v50 }
 0x275   :  { %v1334_v33 = vsub.f32 %v3731_v15, %v3768_v50  ;;  %v1335_v53 = vsub.f32 %v3729_v12, %v3768_v50  ;;  %v1336_v0 = vsub.f32 %v3739_v48, %v3768_v50  ;;  %v1337_v1 = vsub.f32 %v3737_v20, %v3768_v50 }
 0x276   :  { %v1338_v4 = vsub.f32 %v3754_v29, %v3768_v50  ;;  %v1339_v8 = vsub.f32 %v3752_v22, %v3768_v50  ;;  %v1340_v59 = vsub.f32 %v3762_v37, %v3768_v50  ;;  %v1341_v9 = vsub.f32 %v3760_v26, %v3768_v50 }
 0x277   :  { %v1342_v13 = vmul.f32 %v1326_v43, %v1326_v43  ;;  %v1343_v14 = vmul.f32 %v1327_v6, %v1327_v6  ;;  %v1344_v16 = vmul.f32 %v1328_v47, %v1328_v47  ;;  %v1345_v7 = vmul.f32 %v1329_v52, %v1329_v52 }
 0x278   :  { %v1346_v23 = vmul.f32 %v1330_v63, %v1330_v63  ;;  %v1347_v45 = vmul.f32 %v1331_v39, %v1331_v39  ;;  %v1348_v60 = vmul.f32 %v1332_v57, %v1332_v57  ;;  %v1349_v2 = vmul.f32 %v1333_v61, %v1333_v61 }
 0x279   :  { %v1358_v5 = vsel %vm234_vm0, %v1342_v13, 0.0  ;;  %v1359_v18 = vsel %vm234_vm0, %v1343_v14, 0.0  ;;  %v1361_v24 = vsel %vm234_vm0, %v1344_v16, 0.0  ;;  %v1363_v11 = vsel %vm234_vm0, %v1345_v7, 0.0 }
 0x27a   :  { %v1360_v21 = vadd.f32 %v1359_v18, %v1358_v5  ;;  %v1365_v10 = vsel %vm234_vm0, %v1346_v23, 0.0  ;;  %v1367_v31 = vsel %vm234_vm0, %v1347_v45, 0.0  ;;  %v1350_v36 = vmul.f32 %v1334_v33, %v1334_v33  ;;  %v1396_v45 = vld [vmem:[%s4557_s2] sm:$0x1]  ;;  %s2947_s2 = smov 40  }
 0x27b   :  { %v1369_v25 = vsel %vm234_vm0, %v1348_v60, 0.0  ;;  %v1351_v40 = vmul.f32 %v1335_v53, %v1335_v53  ;;  %v1371_v3 = vsel %vm234_vm0, %v1349_v2, 0.0  ;;  %v1352_v41 = vmul.f32 %v1336_v0, %v1336_v0 }
 0x27c   :  { %v1362_v27 = vadd.f32 %v1361_v24, %v1360_v21  ;;  %v1373_v17 = vsel %vm234_vm0, %v1350_v36, 0.0  ;;  %v1353_v44 = vmul.f32 %v1337_v1, %v1337_v1  ;;  %v1354_v43 = vmul.f32 %v1338_v4, %v1338_v4 }
 0x27d   :  { %v1375_v46 = vsel %vm234_vm0, %v1351_v40, 0.0  ;;  %v1377_v6 = vsel %vm234_vm0, %v1352_v41, 0.0  ;;  %v1355_v52 = vmul.f32 %v1339_v8, %v1339_v8  ;;  %v1356_v57 = vmul.f32 %v1340_v59, %v1340_v59 }
 0x27e   :  { %v1364_v28 = vadd.f32 %v1363_v11, %v1362_v27  ;;  %v1379_v63 = vsel %vm234_vm0, %v1353_v44, 0.0  ;;  %v1381_v61 = vsel %vm234_vm0, %v1354_v43, 0.0  ;;  %v1357_v53 = vmul.f32 %v1341_v9, %v1341_v9 }
 0x27f   :  { %v1383_v0 = vsel %vm234_vm0, %v1355_v52, 0.0  ;;  %v1385_v1 = vsel %vm234_vm0, %v1356_v57, 0.0  ;;  %v1404_v27 = vlaneseq }
 0x280   :  { %v1366_v30 = vadd.f32 %v1365_v10, %v1364_v28  ;;  %v1387_v4 = vsel %vm234_vm0, %v1357_v53, 0.0  ;;  %v1400_v10 = vld [vmem:[%s4558_s3] sm:$0x1] }
 0x281   :  { %v1405_v9 = vshrl.u32 %v1404_v27, 7 }
 0x282   :  { %v1368_v35 = vadd.f32 %v1367_v31, %v1366_v30 }
 0x283   :  { %v3821_v11 = vsub.s32 0, %v1405_v9 }
 0x284   :  { %v1370_v32 = vadd.f32 %v1369_v25, %v1368_v35 }
 0x286   :  { %v1372_v38 = vadd.f32 %v1371_v3, %v1370_v32 }
 0x288   :  { %v1374_v42 = vadd.f32 %v1373_v17, %v1372_v38 }
 0x28a   :  { %v1376_v49 = vadd.f32 %v1375_v46, %v1374_v42 }
 0x28c   :  { %v1378_v47 = vadd.f32 %v1377_v6, %v1376_v49 }
 0x28e   :  { %v1380_v39 = vadd.f32 %v1379_v63, %v1378_v47 }
 0x290   :  { %v1382_v33 = vadd.f32 %v1381_v61, %v1380_v39 }
 0x292   :  { %v1384_v13 = vadd.f32 %v1383_v0, %v1382_v33 }
 0x294   :  { %v1386_v14 = vadd.f32 %v1385_v1, %v1384_v13 }
 0x296   :  { %v1388_v16 = vadd.f32 %v1387_v4, %v1386_v14 }
 0x298   :  { %v1389_v7 = vrot.slane %v1388_v16, 4 }
 0x29a   :  { %v1390_v5 = vadd.f32 %v1389_v7, %v1388_v16 }
 0x29c   :  { %v1391_v8 = vrot.slane %v1390_v5, 2 }
 0x29e   :  { %v1392_v18 = vadd.f32 %v1391_v8, %v1390_v5 }
 0x2a0   :  { %v1393_v21 = vrot.slane %v1392_v18, 1 }
 0x2a2   :  { %v1394_v23 = vadd.f32 %v1393_v21, %v1392_v18 }
 0x2a4   :  { %v1395_v59 = vmul.f32 0.0078125, %v1394_v23 }
 0x2a6   :  { %v1397_v24 = vadd.f32 1e-05, %v1395_v59 }
 0x2a8   :  { %2930 = vrsqrt.f32 %v1397_v24 }
 0x2b2   :  { %v2931_v28 = vpop.eup %2930 }
 0x2b3   :  { %v1399_v60 = vmul.f32 %v2931_v28, %v1396_v45 }
 0x2b5   :  { %v1401_v30 = vmul.f32 %v1399_v60, %v3768_v50  ;;  %v1407_v2 = vrot.slane %v1399_v60, %v3821_v11 }
 0x2b7   :  { %v1402_v31 = vsub.f32 %v1400_v10, %v1401_v30  ;;  %v1423_v35 = vmul.f32 %v1407_v2, %v3762_v37  ;;  %v1409_v36 = vmul.f32 %v1407_v2, %v3701_v55  ;;  %v1411_v25 = vmul.f32 %v1407_v2, %v3707_v51  ;;  %v2267_v30 = vld [vmem:[%s4559_s4] sm:$0xff] }
 0x2b8   :  { %v1410_v32 = vmul.f32 %v3697_v34, %v1407_v2  ;;  %v1412_v40 = vmul.f32 %v3705_v56, %v1407_v2  ;;  %v1413_v3 = vmul.f32 %v1407_v2, %v3715_v62  ;;  %v1414_v38 = vmul.f32 %v3713_v58, %v1407_v2 }
 0x2b9   :  { %v1429_v41 = vrot.slane %v1402_v31, %v3821_v11  ;;  %v1415_v50 = vmul.f32 %v1407_v2, %v3723_v54  ;;  %v1416_v17 = vmul.f32 %v3721_v19, %v1407_v2  ;;  %v1417_v37 = vmul.f32 %v1407_v2, %v3731_v15 }
 0x2ba   :  { %v1418_v55 = vmul.f32 %v3729_v12, %v1407_v2  ;;  %v1419_v51 = vmul.f32 %v1407_v2, %v3739_v48  ;;  %v1420_v34 = vmul.f32 %v3737_v20, %v1407_v2  ;;  %v1421_v56 = vmul.f32 %v1407_v2, %v3754_v29 }
 0x2bb   :  { %v1445_v42 = vadd.f32 %v1429_v41, %v1423_v35  ;;  %v1431_v62 = vadd.f32 %v1429_v41, %v1409_v36  ;;  %v1433_v44 = vadd.f32 %v1429_v41, %v1411_v25  ;;  %v1432_v58 = vadd.f32 %v1429_v41, %v1410_v32  ;;  %v2269_v35 = vld [vmem:[%s4559_s4 + $0x10] sm:$0xff]  ;;  %v2270_v36 = vld [vmem:[%s4559_s4 + $0x18] sm:$0xff] }
 0x2bc   :  { %v1434_v46 = vadd.f32 %v1429_v41, %v1412_v40  ;;  %v1435_v49 = vadd.f32 %v1429_v41, %v1413_v3  ;;  %v1436_v43 = vadd.f32 %v1429_v41, %v1414_v38  ;;  %v1437_v54 = vadd.f32 %v1429_v41, %v1415_v50  ;;  %v2271_v40 = vld [vmem:[%s4559_s4 + $0x20] sm:$0xff]  ;;  %v2272_v3 = vld [vmem:[%s4559_s4 + $0x28] sm:$0xff]  ;;  %v2273_v50 = vld [vmem:[%s4559_s4 + $0x30] sm:$0xff] }
 0x2bd   :  { %v1461_v6 = vmax.f32 %v1445_v42, 0.0  ;;  %v1447_v19 = vmax.f32 %v1431_v62, 0.0  ;;  %v1449_v47 = vmax.f32 %v1433_v44, 0.0  ;;  %v1448_v15 = vmax.f32 %v1432_v58, 0.0 }
 0x2be   :  { %v1450_v52 = vmax.f32 %v1434_v46, 0.0  ;;  %v1451_v12 = vmax.f32 %v1435_v49, 0.0  ;;  %v1452_v63 = vmax.f32 %v1436_v43, 0.0  ;;  %v1453_v48 = vmax.f32 %v1437_v54, 0.0  ;;  %v3964_v46 = vpop.permute.xlu0 %1639 }
 0x2bf   :  { %1477 = vst.msk [vmem:[#allocation2 + $0x111] sm:$0xff] %vm234_vm0, %v1461_v6  ;;  %1463 = vst.msk [vmem:[#allocation2 + $0x11] sm:$0xff] %vm234_vm0, %v1447_v19  ;;  %v1438_v20 = vadd.f32 %v1429_v41, %v1416_v17  ;;  %v1439_v29 = vadd.f32 %v1429_v41, %v1417_v37  ;;  %v1440_v39 = vadd.f32 %v1429_v41, %v1418_v55  ;;  %v2274_v17 = vld [vmem:[%s4559_s4 + $0x38] sm:$0xff]  ;;  %v2275_v55 = vld [vmem:[%s4559_s4 + $0x40] sm:$0xff]  ;;  %v3983_v19 = vpop.permute.xlu1 %1719 }
 0x2c0   :  { %1465 = vst.msk [vmem:[#allocation2 + $0x31] sm:$0xff] %vm234_vm0, %v1449_v47  ;;  %1464 = vst.msk [vmem:[#allocation2 + $0x21] sm:$0xff] %vm234_vm0, %v1448_v15  ;;  %v1441_v57 = vadd.f32 %v1429_v41, %v1419_v51  ;;  %v1442_v61 = vadd.f32 %v1429_v41, %v1420_v34  ;;  %v1443_v33 = vadd.f32 %v1429_v41, %v1421_v56 }
 0x2c1   :  { %1466 = vst.msk [vmem:[#allocation2 + $0x41] sm:$0xff] %vm234_vm0, %v1450_v52  ;;  %1467 = vst.msk [vmem:[#allocation2 + $0x51] sm:$0xff] %vm234_vm0, %v1451_v12  ;;  %v1422_v53 = vmul.f32 %v3752_v22, %v1407_v2  ;;  %v1424_v0 = vmul.f32 %v3760_v26, %v1407_v2  ;;  %v1454_v13 = vmax.f32 %v1438_v20, 0.0  ;;  %v1455_v1 = vmax.f32 %v1439_v29, 0.0  ;;  %v2268_v2 = vld [vmem:[%s4559_s4 + $0x8] sm:$0xff] }
 0x2c2   :  { %1468 = vst.msk [vmem:[#allocation2 + $0x61] sm:$0xff] %vm234_vm0, %v1452_v63  ;;  %1469 = vst.msk [vmem:[#allocation2 + $0x71] sm:$0xff] %vm234_vm0, %v1453_v48  ;;  %v1456_v14 = vmax.f32 %v1440_v39, 0.0  ;;  %v1457_v4 = vmax.f32 %v1441_v57, 0.0  ;;  %v1458_v16 = vmax.f32 %v1442_v61, 0.0  ;;  %v1459_v7 = vmax.f32 %v1443_v33, 0.0  ;;  %v3972_v43 = vpop.permute.xlu0 %1703 }
 0x2c3   :  { %v1444_v5 = vadd.f32 %v1429_v41, %v1422_v53  ;;  %v1446_v8 = vadd.f32 %v1429_v41, %v1424_v0  ;;  %1470 = vst.msk [vmem:[#allocation2 + $0x81] sm:$0xff] %vm234_vm0, %v1454_v13  ;;  %1471 = vst.msk [vmem:[#allocation2 + $0xb1] sm:$0xff] %vm234_vm0, %v1455_v1  ;;  %v2891_v31 = vpack.c.bf16 %v2268_v2, %v2267_v30  ;;  %v3991_v63 = vpop.permute.xlu1 %2101 }
 0x2c4   :  { %1472 = vst.msk [vmem:[#allocation2 + $0xc1] sm:$0xff] %vm234_vm0, %v1456_v14  ;;  %1473 = vst.msk [vmem:[#allocation2 + $0xd1] sm:$0xff] %vm234_vm0, %v1457_v4  ;;  %v2895_v25 = vpack.c.bf16 %v2270_v36, %v2269_v35  ;;  %v2899_v38 = vpack.c.bf16 %v2272_v3, %v2271_v40  ;;  %v2903_v37 = vpack.c.bf16 %v2274_v17, %v2273_v50  ;;  %v1479_v36 = vld [vmem:[#allocation2] sm:$0xff] }
 0x2c5   :  { %1474 = vst.msk [vmem:[#allocation2 + $0xe1] sm:$0xff] %vm234_vm0, %v1458_v16  ;;  %1475 = vst.msk [vmem:[#allocation2 + $0xf1] sm:$0xff] %vm234_vm0, %v1459_v7  ;;  %v1460_v22 = vmax.f32 %v1444_v5, 0.0  ;;  %v1462_v26 = vmax.f32 %v1446_v8, 0.0  ;;  %2892 = vmatprep.subr.bf16.mxu0 %v2891_v31  ;;  %2907 = vmatprep.subr.bf16.mxu1 %v2891_v31 }
 0x2c6   :  { %v1512_v18 = vld [vmem:[#allocation2 + $0x12] sm:$0xff]  ;;  %2894 = vmatpush3.bf16.msra.mxu0 %v2891_v31  ;;  %2912 = vmatpush3.bf16.msra.mxu1 %v2891_v31  ;;  %v3979_v6 = vpop.permute.xlu0 %1655 }
 0x2c7   :  { %v1496_v21 = vld [vmem:[#allocation2 + $0x11] sm:$0xff]  ;;  %1476 = vst.msk [vmem:[#allocation2 + $0x101] sm:$0xff] %vm234_vm0, %v1460_v22  ;;  %1478 = vst.msk [vmem:[#allocation2 + $0x121] sm:$0xff] %vm234_vm0, %v1462_v26  ;;  %1705 = vrot.lane.b32.xlu0 %v1512_v18, %s2939_s19  ;;  %v1497_v59 = vld [vmem:[#allocation2 + $0x21] sm:$0xff]  ;;  %2896 = vmatprep.subr.bf16.mxu0 %v2895_v25 }
 0x2c8   :  { %1641 = vrot.lane.b32.xlu1 %v1496_v21, %s2936_s12  ;;  %v3863_v23 = vld [vmem:[#allocation2 + $0x31] sm:$0xff]  ;;  %v3868_v24 = vld [vmem:[#allocation2 + $0x20] sm:$0xff]  ;;  %2908 = vmatprep.subr.bf16.mxu1 %v2895_v25 }
 0x2c9   :  { %v3870_v27 = vld [vmem:[#allocation2 + $0x10] sm:$0xff]  ;;  %v1513_v45 = vld [vmem:[#allocation2 + $0x22] sm:$0xff] }
 0x2ca   :  { %v3876_v9 = vld [vmem:[#allocation2 + $0x32] sm:$0xff]  ;;  %v3883_v28 = vld [vmem:[#allocation2 + $0x40] sm:$0xff]  ;;  %2898 = vmatpush3.bf16.msra.mxu0 %v2895_v25  ;;  %2913 = vmatpush3.bf16.msra.mxu1 %v2895_v25  ;;  %v3985_v47 = vpop.permute.xlu0 %1973 }
 0x2cb   :  { %1645 = vrot.lane.b32.xlu0 %v3863_v23, %s2936_s12  ;;  %v3885_v60 = vld [vmem:[#allocation2 + $0x30] sm:$0xff]  ;;  %v1499_v10 = vld [vmem:[#allocation2 + $0x41] sm:$0xff]  ;;  %2900 = vmatprep.subr.bf16.mxu0 %v2899_v38 }
 0x2cc   :  { %1643 = vrot.lane.b32.xlu1 %v1497_v59, %s2936_s12  ;;  %v1515_v32 = vld [vmem:[#allocation2 + $0x42] sm:$0xff]  ;;  %v1500_v41 = vld [vmem:[#allocation2 + $0x51] sm:$0xff]  ;;  %2909 = vmatprep.subr.bf16.mxu1 %v2899_v38 }
 0x2cd   :  { %v3937_v51 = vld [vmem:[#allocation2 + $0x50] sm:$0xff]  ;;  %v3945_v56 = vld [vmem:[#allocation2 + $0x60] sm:$0xff] }
 0x2ce   :  { %2902 = vmatpush3.bf16.msra.mxu0 %v2899_v38  ;;  %2914 = vmatpush3.bf16.msra.mxu1 %v2899_v38  ;;  %v1516_v34 = vld [vmem:[#allocation2 + $0x52] sm:$0xff]  ;;  %v1501_v42 = vld [vmem:[#allocation2 + $0x61] sm:$0xff]  ;;  %v3993_v48 = vpop.permute.xlu0 %2037 }
 0x2cf   :  { %1769 = vrot.lane.b32.xlu0 %v3868_v24, %s2941_s30  ;;  %2904 = vmatprep.subr.bf16.mxu0 %v2903_v37  ;;  %v1502_v62 = vld [vmem:[#allocation2 + $0x71] sm:$0xff]  ;;  %v1564_v44 = vld [vmem:[#allocation2 + $0x62] sm:$0xff] }
 0x2d0   :  { %1767 = vrot.lane.b32.xlu1 %v3870_v27, %s2941_s30  ;;  %2910 = vmatprep.subr.bf16.mxu1 %v2903_v37  ;;  %v1518_v58 = vld [vmem:[#allocation2 + $0x72] sm:$0xff]  ;;  %v1534_v54 = vld [vmem:[#allocation2 + $0x80] sm:$0xff] }
 0x2d1   :  { %v3966_v49 = vld [vmem:[#allocation2 + $0x70] sm:$0xff]  ;;  %v1566_v52 = vld [vmem:[#allocation2 + $0x82] sm:$0xff] }
 0x2d2   :  { %2906 = vmatpush3.bf16.msra.mxu0 %v2903_v37  ;;  %2915 = vmatpush3.bf16.msra.mxu1 %v2903_v37  ;;  %v1504_v15 = vld [vmem:[#allocation2 + $0xb1] sm:$0xff]  ;;  %v1550_v12 = vld [vmem:[#allocation2 + $0x81] sm:$0xff] }
 0x2d3   :  { %1709 = vrot.lane.b32.xlu0 %v3876_v9, %s2939_s19  ;;  %2857 = vmatprep.subr.mxu0 %v2275_v55  ;;  %v1520_v20 = vld [vmem:[#allocation2 + $0xb2] sm:$0xff]  ;;  %v4001_v57 = vld [vmem:[#allocation2 + $0xc0] sm:$0xff] }
 0x2d4   :  { %1707 = vrot.lane.b32.xlu1 %v1513_v45, %s2939_s19  ;;  %2911 = vmatprep.subr.mxu1 %v2275_v55  ;;  %v1505_v53 = vld [vmem:[#allocation2 + $0xc1] sm:$0xff]  ;;  %v4010_v0 = vld [vmem:[#allocation2 + $0xb0] sm:$0xff] }
 0x2d5   :  { %v1506_v16 = vld [vmem:[#allocation2 + $0xd1] sm:$0xff]  ;;  %v1568_v8 = vld [vmem:[#allocation2 + $0xc2] sm:$0xff] }
 0x2d6   :  { %2858 = vmatpush3.msra.mxu0 %v2275_v55  ;;  %2916 = vmatpush3.msra.mxu1 %v2275_v55  ;;  %v4059_v25 = vld [vmem:[#allocation2 + $0xe1] sm:$0xff]  ;;  %v1508_v55 = vld [vmem:[#allocation2 + $0xf1] sm:$0xff] }
 0x2d7   :  { %1833 = vrot.lane.b32.xlu0 %v1497_v59, %s2943_s1 }
 0x2d8   :  { %1831 = vrot.lane.b32.xlu1 %v1496_v21, %s2943_s1 }
 0x2db   :  { %1773 = vrot.lane.b32.xlu0 %v3883_v28, %s2941_s30 }
 0x2dc   :  { %1771 = vrot.lane.b32.xlu1 %v3885_v60, %s2941_s30 }
 0x2df   :  { %1897 = vrot.lane.b32.xlu0 %v1513_v45, %s2947_s2 }
 0x2e0   :  { %1895 = vrot.lane.b32.xlu1 %v1512_v18, %s2947_s2  ;;  %v1522_v18 = vld [vmem:[#allocation2 + $0xd2] sm:$0xff] }
 0x2e3   :  { %1647 = vrot.lane.b32.xlu0 %v1499_v10, %s2936_s12 }
 0x2e4   :  { %1835 = vrot.lane.b32.xlu1 %v3863_v23, %s2943_s1 }
 0x2e7   :  { %1899 = vrot.lane.b32.xlu0 %v3876_v9, %s2947_s2 }
 0x2e8   :  { %1959 = vrot.lane.b32.xlu1 %v3868_v24, %s2944_s0 }
 0x2eb   :  { %2023 = vrot.lane.b32.xlu0 %v1497_v59, %s2946_s29  ;;  %v4037_v59 = vld [vmem:[#allocation2 + $0xd0] sm:$0xff] }
 0x2ec   :  { %1837 = vrot.lane.b32.xlu1 %v1499_v10, %s2943_s1 }
 0x2ef   :  { %1711 = vrot.lane.b32.xlu0 %v1515_v32, %s2939_s19 }
 0x2f0   :  { %1961 = vrot.lane.b32.xlu1 %v3885_v60, %s2944_s0 }
 0x2f3   :  { %1963 = vrot.lane.b32.xlu0 %v3883_v28, %s2944_s0 }
 0x2f4   :  { %1649 = vrot.lane.b32.xlu1 %v1500_v41, %s2936_s12 }
 0x2f7   :  { %2087 = vrot.lane.b32.xlu0 %v1513_v45, %s2945_s13 }
 0x2f8   :  { %1901 = vrot.lane.b32.xlu1 %v1515_v32, %s2947_s2 }
 0x2fb   :  { %1775 = vrot.lane.b32.xlu0 %v3937_v51, %s2941_s30 }
 0x2fc   :  { %2025 = vrot.lane.b32.xlu1 %v3863_v23, %s2946_s29 }
 0x2ff   :  { %2027 = vrot.lane.b32.xlu0 %v1499_v10, %s2946_s29  ;;  %v4046_v10 = vld [vmem:[#allocation2 + $0xe0] sm:$0xff] }
 0x300   :  { %1713 = vrot.lane.b32.xlu1 %v1516_v34, %s2939_s19 }
 0x303   :  { %1777 = vrot.lane.b32.xlu0 %v3945_v56, %s2941_s30 }
 0x304   :  { %1965 = vrot.lane.b32.xlu1 %v3937_v51, %s2944_s0 }
 0x307   :  { %2029 = vrot.lane.b32.xlu0 %v1500_v41, %s2946_s29 }
 0x308   :  { %2089 = vrot.lane.b32.xlu1 %v3876_v9, %s2945_s13 }
 0x30b   :  { %1651 = vrot.lane.b32.xlu0 %v1501_v42, %s2936_s12 }
 0x30c   :  { %1839 = vrot.lane.b32.xlu1 %v1500_v41, %s2943_s1 }
 0x30f   :  { %1903 = vrot.lane.b32.xlu0 %v1516_v34, %s2947_s2 }
 0x310   :  { %2091 = vrot.lane.b32.xlu1 %v1515_v32, %s2945_s13  ;;  %v2135_v32 = vsel %vm234_vm0, %v1479_v36, %v3964_v46 }
 0x311   :  { %v2151_v38 = vsel %vm999_vm5, %v2135_v32, %v3972_v43  ;;  %v1570_v43 = vld [vmem:[#allocation2 + $0xe2] sm:$0xff] }
 0x313   :  { %1653 = vrot.lane.b32.xlu0 %v1502_v62, %s2936_s12 }
 0x314   :  { %1841 = vrot.lane.b32.xlu1 %v1501_v42, %s2943_s1 }
 0x317   :  { %1905 = vrot.lane.b32.xlu0 %v1564_v44, %s2947_s2 }
 0x318   :  { %2093 = vrot.lane.b32.xlu1 %v1516_v34, %s2945_s13 }
 0x31b   :  { %1717 = vrot.lane.b32.xlu0 %v1518_v58, %s2939_s19 }
 0x31c   :  { %1715 = vrot.lane.b32.xlu1 %v1564_v44, %s2939_s19 }
 0x31f   :  { %1969 = vrot.lane.b32.xlu0 %v3966_v49, %s2944_s0 }
 0x320   :  { %1967 = vrot.lane.b32.xlu1 %v3945_v56, %s2944_s0 }
 0x323   :  { %1781 = vrot.lane.b32.xlu0 %v1534_v54, %s2941_s30 }
 0x324   :  { %1779 = vrot.lane.b32.xlu1 %v3966_v49, %s2941_s30 }
 0x327   :  { %2033 = vrot.lane.b32.xlu0 %v1502_v62, %s2946_s29 }
 0x328   :  { %2031 = vrot.lane.b32.xlu1 %v1501_v42, %s2946_s29 }
 0x32b   :  { %1907 = vrot.lane.b32.xlu0 %v1518_v58, %s2947_s2 }
 0x32c   :  { %1843 = vrot.lane.b32.xlu1 %v1502_v62, %s2943_s1 }
 0x32f   :  { %1657 = vrot.lane.b32.xlu0 %v1504_v15, %s2936_s12 }
 0x330   :  { %2095 = vrot.lane.b32.xlu1 %v1564_v44, %s2945_s13 }
 0x333   :  { %1909 = vrot.lane.b32.xlu0 %v1566_v52, %s2947_s2 }
 0x334   :  { %1845 = vrot.lane.b32.xlu1 %v1550_v12, %s2943_s1 }
 0x337   :  { %1721 = vrot.lane.b32.xlu0 %v1520_v20, %s2939_s19 }
 0x338   :  { %2097 = vrot.lane.b32.xlu1 %v1518_v58, %s2945_s13 }
 0x339   :  { %v3997_v29 = vpop.permute.xlu0 %1705 }
 0x33a   :  { %v3999_v39 = vpop.permute.xlu1 %1641 }
 0x33b   :  { %1785 = vrot.lane.b32.xlu0 %v4001_v57, %s2941_s30 }
 0x33c   :  { %1971 = vrot.lane.b32.xlu1 %v1534_v54, %s2944_s0 }
 0x33d   :  { %v4006_v61 = vpop.permute.xlu0 %1645 }
 0x33e   :  { %v4008_v33 = vpop.permute.xlu1 %1643 }
 0x33f   :  { %1659 = vrot.lane.b32.xlu0 %v1505_v53, %s2936_s12 }
 0x340   :  { %1783 = vrot.lane.b32.xlu1 %v4010_v0, %s2941_s30 }
 0x341   :  { %v4015_v13 = vpop.permute.xlu0 %1769 }
 0x342   :  { %v1768_v1 = vpop.permute.xlu1 %1767 }
 0x343   :  { %1911 = vrot.lane.b32.xlu0 %v1520_v20, %s2947_s2  ;;  %v2167_v41 = vsel %vm1033_vm7, %v2151_v38, %v1768_v1  ;;  %v4098_v1 = vld [vmem:[#allocation2 + $0xf0] sm:$0xff] }
 0x344   :  { %2035 = vrot.lane.b32.xlu1 %v1550_v12, %s2946_s29  ;;  %v2136_v12 = vsel %vm234_vm0, %v3870_v27, %v3999_v39  ;;  %v4111_v39 = vld [vmem:[#allocation2 + $0x100] sm:$0xff] }
 0x345   :  { %v4019_v14 = vpop.permute.xlu0 %1709 }
 0x346   :  { %v4021_v4 = vpop.permute.xlu1 %1707 }
 0x347   :  { %1661 = vrot.lane.b32.xlu0 %v1506_v16, %s2936_s12 }
 0x348   :  { %1847 = vrot.lane.b32.xlu1 %v1504_v15, %s2943_s1 }
 0x349   :  { %v4025_v7 = vpop.permute.xlu0 %1833 }
 0x34a   :  { %v1832_v5 = vpop.permute.xlu1 %1831 }
 0x34b   :  { %1913 = vrot.lane.b32.xlu0 %v1568_v8, %s2947_s2  ;;  %v2183_v37 = vsel %vm1067_vm9, %v2167_v41, %v1832_v5 }
 0x34c   :  { %2099 = vrot.lane.b32.xlu1 %v1566_v52, %s2945_s13  ;;  %v4088_v52 = vld [vmem:[#allocation2 + $0xf2] sm:$0xff] }
 0x34d   :  { %v4029_v22 = vpop.permute.xlu0 %1773 }
 0x34e   :  { %v4031_v26 = vpop.permute.xlu1 %1771 }
 0x34f   :  { %1725 = vrot.lane.b32.xlu0 %v1522_v18, %s2939_s19 }
 0x350   :  { %1849 = vrot.lane.b32.xlu1 %v1505_v53, %s2943_s1 }
 0x351   :  { %v4035_v21 = vpop.permute.xlu0 %1897 }
 0x352   :  { %v1896_v23 = vpop.permute.xlu1 %1895 }
 0x353   :  { %1977 = vrot.lane.b32.xlu0 %v4037_v59, %s2944_s0  ;;  %v2200_v34 = vsel %vm2199_vm11, %v2183_v37, %v1896_v23 }
 0x354   :  { %1723 = vrot.lane.b32.xlu1 %v1568_v8, %s2939_s19 }
 0x355   :  { %v4042_v9 = vpop.permute.xlu0 %1647 }
 0x356   :  { %v4044_v45 = vpop.permute.xlu1 %1835 }
 0x357   :  { %1789 = vrot.lane.b32.xlu0 %v4046_v10, %s2941_s30 }
 0x358   :  { %1975 = vrot.lane.b32.xlu1 %v4001_v57, %s2944_s0 }
 0x359   :  { %v4052_v30 = vpop.permute.xlu0 %1899 }
 0x35a   :  { %v1960_v2 = vpop.permute.xlu1 %1959 }
 0x35b   :  { %2041 = vrot.lane.b32.xlu0 %v1506_v16, %s2946_s29  ;;  %v2217_v42 = vsel %vm2216_vm12, %v2200_v34, %v1960_v2 }
 0x35c   :  { %1787 = vrot.lane.b32.xlu1 %v4037_v59, %s2941_s30 }
 0x35d   :  { %v2024_v31 = vpop.permute.xlu0 %2023 }
 0x35e   :  { %v4057_v35 = vpop.permute.xlu1 %1837  ;;  %v2234_v62 = vsel %vm2233_vm13, %v2217_v42, %v2024_v31 }
 0x35f   :  { %1663 = vrot.lane.b32.xlu0 %v4059_v25, %s2936_s12 }
 0x360   :  { %2039 = vrot.lane.b32.xlu1 %v1505_v53, %s2946_s29 }
 0x361   :  { %v4066_v40 = vpop.permute.xlu0 %1711 }
 0x362   :  { %v1962_v3 = vpop.permute.xlu1 %1961 }
 0x363   :  { %1915 = vrot.lane.b32.xlu0 %v1522_v18, %s2947_s2 }
 0x364   :  { %1851 = vrot.lane.b32.xlu1 %v1506_v16, %s2943_s1  ;;  %v2152_v16 = vsel %vm999_vm5, %v2136_v12, %v3997_v29  ;;  %v1572_v12 = vld [vmem:[#allocation2 + $0x102] sm:$0xff] }
 0x365   :  { %v1964_v50 = vpop.permute.xlu0 %1963  ;;  %v2168_v5 = vsel %vm1033_vm7, %v2152_v16, %v4015_v13 }
 0x366   :  { %v4073_v17 = vpop.permute.xlu1 %1649  ;;  %v2184_v27 = vsel %vm1067_vm9, %v2168_v5, %v4025_v7  ;;  %v2137_v7 = vsel %vm234_vm0, %v3868_v24, %v4008_v33  ;;  %v1509_v24 = vld [vmem:[#allocation2 + $0x101] sm:$0xff]  ;;  %v4174_v5 = vld [vmem:[#allocation2 + $0x110] sm:$0xff] }
 0x367   :  { %1665 = vrot.lane.b32.xlu0 %v1508_v55, %s2936_s12  ;;  %v2201_v23 = vsel %vm2199_vm11, %v2184_v27, %v4035_v21  ;;  %v2153_v21 = vsel %vm999_vm5, %v2137_v7, %v4021_v4 }
 0x368   :  { %2103 = vrot.lane.b32.xlu1 %v1568_v8, %s2945_s13  ;;  %v2218_v29 = vsel %vm2216_vm12, %v2201_v23, %v1962_v3  ;;  %v2169_v32 = vsel %vm1033_vm7, %v2153_v21, %v4031_v26  ;;  %v1542_v23 = vld [vmem:[#allocation2 + $0x120] sm:$0xff] }
 0x369   :  { %v2088_v44 = vpop.permute.xlu0 %2087  ;;  %v2185_v41 = vsel %vm1067_vm9, %v2169_v32, %v4044_v45  ;;  %v2138_v45 = vsel %vm234_vm0, %v3885_v60, %v4006_v61  ;;  %v1510_v60 = vld [vmem:[#allocation2 + $0x111] sm:$0xff]  ;;  %v1558_v32 = vld [vmem:[#allocation2 + $0x121] sm:$0xff] }
 0x36a   :  { %v1902_v58 = vpop.permute.xlu1 %1901  ;;  %v2251_v46 = vsel %vm2250_vm14, %v2234_v62, %v2088_v44  ;;  %v2202_v33 = vsel %vm2199_vm11, %v2185_v41, %v4052_v30  ;;  %v2154_v30 = vsel %vm999_vm5, %v2138_v45, %v4019_v14 }
 0x36b   :  { %1917 = vrot.lane.b32.xlu0 %v1570_v43, %s2947_s2  ;;  %2859 = vmatprep.mubr.msk.f32.mxu0 %vm2276_vm15, %v2251_v46  ;;  %v2219_v4 = vsel %vm2216_vm12, %v2202_v33, %v1964_v50 }
 0x36c   :  { %1853 = vrot.lane.b32.xlu1 %v4059_v25, %s2943_s1 }
 0x36d   :  { %v4086_v54 = vpop.permute.xlu0 %1775 }
 0x36e   :  { %v2026_v15 = vpop.permute.xlu1 %2025 }
 0x36f   :  { %1729 = vrot.lane.b32.xlu0 %v4088_v52, %s2939_s19  ;;  %v2235_v13 = vsel %vm2233_vm13, %v2218_v29, %v2026_v15 }
 0x370   :  { %2105 = vrot.lane.b32.xlu1 %v1522_v18, %s2945_s13 }
 0x371   :  { %v2028_v20 = vpop.permute.xlu0 %2027 }
 0x372   :  { %v4096_v53 = vpop.permute.xlu1 %1713  ;;  %v2236_v37 = vsel %vm2233_vm13, %v2219_v4, %v2028_v20  ;;  %v1526_v20 = vld [vmem:[#allocation2 + $0x112] sm:$0xff] }
 0x373   :  { %1981 = vrot.lane.b32.xlu0 %v4098_v1, %s2944_s0 }
 0x374   :  { %1727 = vrot.lane.b32.xlu1 %v1570_v43, %s2939_s19 }
 0x375   :  { %v4107_v8 = vpop.permute.xlu0 %1777 }
 0x376   :  { %v1966_v18 = vpop.permute.xlu1 %1965 }
 0x377   :  { %1793 = vrot.lane.b32.xlu0 %v4111_v39, %s2941_s30 }
 0x378   :  { %1979 = vrot.lane.b32.xlu1 %v4046_v10, %s2944_s0 }
 0x379   :  { %v2030_v2 = vpop.permute.xlu0 %2029 }
 0x37a   :  { %v2090_v31 = vpop.permute.xlu1 %2089 }
 0x37b   :  { %v2252_v36 = vsel %vm2250_vm14, %v2235_v13, %v2090_v31  ;;  %2045 = vrot.lane.b32.xlu0 %v1508_v55, %s2946_s29  ;;  %v2139_v13 = vsel %vm234_vm0, %v3883_v28, %v4042_v9 }
 0x37c   :  { %1791 = vrot.lane.b32.xlu1 %v4098_v1, %s2941_s30  ;;  %2860 = vmatmul.mubr.msk.f32.vlgmr.msra.gmra.mrb[16].mxu0 %vm2276_vm15, %v2252_v36 }
 0x37d   :  { %v4133_v3 = vpop.permute.xlu0 %1651 }
 0x37e   :  { %v1840_v38 = vpop.permute.xlu1 %1839 }
 0x37f   :  { %1667 = vrot.lane.b32.xlu0 %v1509_v24, %s2936_s12 }
 0x380   :  { %2043 = vrot.lane.b32.xlu1 %v4059_v25, %s2946_s29  ;;  %v2170_v25 = vsel %vm1033_vm7, %v2154_v30, %v4029_v22 }
 0x381   :  { %v1904_v26 = vpop.permute.xlu0 %1903  ;;  %v2186_v44 = vsel %vm1067_vm9, %v2170_v25, %v4057_v35 }
 0x382   :  { %v2092_v34 = vpop.permute.xlu1 %2091  ;;  %v2203_v61 = vsel %vm2199_vm11, %v2186_v44, %v1902_v58 }
 0x383   :  { %v2253_v42 = vsel %vm2250_vm14, %v2236_v37, %v2092_v34  ;;  %1919 = vrot.lane.b32.xlu0 %v4088_v52, %s2947_s2  ;;  %v2220_v14 = vsel %vm2216_vm12, %v2203_v61, %v1966_v18 }
 0x384   :  { %1855 = vrot.lane.b32.xlu1 %v1508_v55, %s2943_s1  ;;  %2862 = vmatprep.mubr.msk.f32.mxu1 %vm2276_vm15, %v2253_v42  ;;  %v2237_v55 = vsel %vm2233_vm13, %v2220_v14, %v2030_v2  ;;  %v2155_v2 = vsel %vm999_vm5, %v2139_v13, %v4066_v40 }
 0x385   :  { %v4156_v50 = vpop.permute.xlu0 %1653  ;;  %v2171_v31 = vsel %vm1033_vm7, %v2155_v2, %v4086_v54 }
 0x386   :  { %v1842_v62 = vpop.permute.xlu1 %1841  ;;  %v2187_v21 = vsel %vm1067_vm9, %v2171_v31, %v1840_v38  ;;  %v2140_v38 = vsel %vm234_vm0, %v3937_v51, %v4073_v17  ;;  %v2142_v44 = vsel %vm234_vm0, %v3966_v49, %v4156_v50 }
 0x387   :  { %1669 = vrot.lane.b32.xlu0 %v1510_v60, %s2936_s12  ;;  %v2204_v41 = vsel %vm2199_vm11, %v2187_v21, %v1904_v26 }
 0x388   :  { %2107 = vrot.lane.b32.xlu1 %v1570_v43, %s2945_s13 }
 0x389   :  { %v1906_v46 = vpop.permute.xlu0 %1905 }
 0x38a   :  { %v2094_v15 = vpop.permute.xlu1 %2093 }
 0x38b   :  { %v2254_v22 = vsel %vm2250_vm14, %v2237_v55, %v2094_v15  ;;  %1921 = vrot.lane.b32.xlu0 %v1572_v12, %s2947_s2 }
 0x38c   :  { %1857 = vrot.lane.b32.xlu1 %v1509_v24, %s2943_s1  ;;  %2863 = vmatmul.mubr.msk.f32.vlgmr.msra.gmra.mrb[0].mxu1 %vm2276_vm15, %v2254_v22  ;;  %v1606_v22 = vld [vmem:[#allocation2 + $0x131] sm:$0xff] }
 0x38d   :  { %v1718_v35 = vpop.permute.xlu0 %1717 }
 0x38e   :  { %v4169_v58 = vpop.permute.xlu1 %1715  ;;  %v2158_v61 = vsel %vm999_vm5, %v2142_v44, %v1718_v35 }
 0x38f   :  { %1733 = vrot.lane.b32.xlu0 %v1526_v20, %s2939_s19 }
 0x390   :  { %2109 = vrot.lane.b32.xlu1 %v4088_v52, %s2945_s13 }
 0x391   :  { %v1970_v43 = vpop.permute.xlu0 %1969 }
 0x392   :  { %v1968_v16 = vpop.permute.xlu1 %1967 }
 0x393   :  { %1985 = vrot.lane.b32.xlu0 %v4174_v5, %s2944_s0  ;;  %v2221_v28 = vsel %vm2216_vm12, %v2204_v41, %v1968_v16 }
 0x394   :  { %1731 = vrot.lane.b32.xlu1 %v1572_v12, %s2939_s19 }
 0x395   :  { %v1782_v18 = vpop.permute.xlu0 %1781 }
 0x396   :  { %v4179_v27 = vpop.permute.xlu1 %1779 }
 0x397   :  { %1797 = vrot.lane.b32.xlu0 %v1542_v23, %s2941_s30 }
 0x398   :  { %1983 = vrot.lane.b32.xlu1 %v4111_v39, %s2944_s0 }
 0x399   :  { %v2034_v29 = vpop.permute.xlu0 %2033 }
 0x39a   :  { %v2032_v52 = vpop.permute.xlu1 %2031 }
 0x39b   :  { %2049 = vrot.lane.b32.xlu0 %v1510_v60, %s2946_s29  ;;  %v2238_v9 = vsel %vm2233_vm13, %v2221_v28, %v2032_v52 }
 0x39c   :  { %1795 = vrot.lane.b32.xlu1 %v4174_v5, %s2941_s30 }
 0x39d   :  { %v1908_v36 = vpop.permute.xlu0 %1907 }
 0x39e   :  { %v1844_v7 = vpop.permute.xlu1 %1843 }
 0x39f   :  { %1861 = vrot.lane.b32.xlu0 %v1558_v32, %s2943_s1 }
 0x3a0   :  { %2047 = vrot.lane.b32.xlu1 %v1509_v24, %s2946_s29  ;;  %v2156_v24 = vsel %vm999_vm5, %v2140_v38, %v4096_v53 }
 0x3a1   :  { %v4200_v33 = vpop.permute.xlu0 %1657  ;;  %v2172_v4 = vsel %vm1033_vm7, %v2156_v24, %v4107_v8 }
 0x3a2   :  { %v2096_v40 = vpop.permute.xlu1 %2095  ;;  %v2188_v34 = vsel %vm1067_vm9, %v2172_v4, %v1842_v62  ;;  %v1621_v62 = vld [vmem:[#allocation2 + $0x122] sm:$0xff] }
 0x3a3   :  { %v2255_v54 = vsel %vm2250_vm14, %v2238_v9, %v2096_v40  ;;  %2113 = vrot.lane.b32.xlu0 %v1526_v20, %s2945_s13  ;;  %v2205_v42 = vsel %vm2199_vm11, %v2188_v34, %v1906_v46  ;;  %v2174_v46 = vsel %vm1033_vm7, %v2158_v61, %v1782_v18  ;;  %v1622_v18 = vld [vmem:[#allocation2 + $0x132] sm:$0xff]  ;;  %v2934_v40 = vld [vmem:[#allocation2 + $0xa0] sm:$0xff] }
 0x3a4   :  { %1859 = vrot.lane.b32.xlu1 %v1510_v60, %s2943_s1  ;;  %2865 = vmatprep.mubr.msk.f32.mxu1 %vm2276_vm15, %v2255_v54  ;;  %v2222_v51 = vsel %vm2216_vm12, %v2205_v42, %v1970_v43  ;;  %v1590_v60 = vld [vmem:[#allocation2 + $0x130] sm:$0xff]  ;;  %v2143_v54 = vsel %vm234_vm0, %v2934_v40, %v3979_v6  ;;  %v2144_v6 = vsel %vm234_vm0, %v4010_v0, %v4200_v33 }
 0x3a5   :  { %v1910_v37 = vpop.permute.xlu0 %1909  ;;  %v2239_v17 = vsel %vm2233_vm13, %v2222_v51, %v2034_v29 }
 0x3a6   :  { %v1846_v26 = vpop.permute.xlu1 %1845 }
 0x3a7   :  { %1987 = vrot.lane.b32.xlu0 %v1542_v23, %s2944_s0  ;;  %v2190_v15 = vsel %vm1067_vm9, %v2174_v46, %v1846_v26 }
 0x3a8   :  { %2111 = vrot.lane.b32.xlu1 %v1572_v12, %s2945_s13  ;;  %v2141_v12 = vsel %vm234_vm0, %v3945_v56, %v4133_v3  ;;  %v2207_v50 = vsel %vm2199_vm11, %v2190_v15, %v1910_v37 }
 0x3a9   :  { %v4219_v53 = vpop.permute.xlu0 %1721  ;;  %v2157_v49 = vsel %vm999_vm5, %v2141_v12, %v4169_v58  ;;  %v2224_v23 = vsel %vm2216_vm12, %v2207_v50, %v3985_v47 }
 0x3aa   :  { %v2098_v45 = vpop.permute.xlu1 %2097  ;;  %v2173_v35 = vsel %vm1033_vm7, %v2157_v49, %v4179_v27  ;;  %v2241_v27 = vsel %vm2233_vm13, %v2224_v23, %v3993_v48 }
 0x3ab   :  { %v2256_v30 = vsel %vm2250_vm14, %v2239_v17, %v2098_v45  ;;  %2051 = vrot.lane.b32.xlu0 %v1558_v32, %s2946_s29  ;;  %v2189_v16 = vsel %vm1067_vm9, %v2173_v35, %v1844_v7  ;;  %v2258_v47 = vsel %vm2250_vm14, %v2241_v27, %v3991_v63  ;;  %v2159_v63 = vsel %vm999_vm5, %v2143_v54, %v3983_v19 }
 0x3ac   :  { %1923 = vrot.lane.b32.xlu1 %v1526_v20, %s2947_s2  ;;  %2866 = vmatmul.mubr.msk.f32.gmra.mrb[2].mxu1 %vm2276_vm15, %v2256_v30  ;;  %v2206_v3 = vsel %vm2199_vm11, %v2189_v16, %v1908_v36  ;;  %v2160_v19 = vsel %vm999_vm5, %v2144_v6, %v4219_v53 }
 0x3ad   :  { %v4225_v8 = vpop.permute.xlu0 %1785 }
 0x3ae   :  { %v1972_v25 = vpop.permute.xlu1 %1971 }
 0x3af   :  { %2115 = vrot.lane.b32.xlu0 %v1621_v62, %s2945_s13  ;;  %v2223_v58 = vsel %vm2216_vm12, %v2206_v3, %v1972_v25 }
 0x3b0   :  { %1925 = vrot.lane.b32.xlu1 %v1621_v62, %s2947_s2  ;;  %v2176_v62 = vsel %vm1033_vm7, %v2160_v19, %v4225_v8 }
 0x3b1   :  { %v4233_v14 = vpop.permute.xlu0 %1659 }
 0x3b2   :  { %v1784_v55 = vpop.permute.xlu1 %1783  ;;  %v2145_v50 = vsel %vm234_vm0, %v4001_v57, %v4233_v14 }
 0x3b3   :  { %v2175_v4 = vsel %vm1033_vm7, %v2159_v63, %v1784_v55 }
 0x3b4   :  { %1989 = vrot.lane.b32.xlu1 %v1590_v60, %s2944_s0 }
 0x3b5   :  { %v1912_v20 = vpop.permute.xlu0 %1911 }
 0x3b6   :  { %v2036_v43 = vpop.permute.xlu1 %2035 }
 0x3b7   :  { %v2240_v52 = vsel %vm2233_vm13, %v2223_v58, %v2036_v43 }
 0x3b8   :  { %2053 = vrot.lane.b32.xlu1 %v1606_v22, %s2946_s29 }
 0x3b9   :  { %v4250_v29 = vpop.permute.xlu0 %1661 }
 0x3ba   :  { %v1848_v56 = vpop.permute.xlu1 %1847 }
 0x3bb   :  { %v2191_v37 = vsel %vm1067_vm9, %v2175_v4, %v1848_v56 }
 0x3bc   :  { %2117 = vrot.lane.b32.xlu1 %v1622_v18, %s2945_s13  ;;  %v2208_v42 = vsel %vm2199_vm11, %v2191_v37, %v1912_v20 }
 0x3bd   :  { %v1914_v13 = vpop.permute.xlu0 %1913 }
 0x3be   :  { %v2100_v2 = vpop.permute.xlu1 %2099 }
 0x3bf   :  { %v2257_v31 = vsel %vm2250_vm14, %v2240_v52, %v2100_v2 }
 0x3c0   :  { %2868 = vmatprep.mubr.msk.f32.mxu1 %vm2276_vm15, %v2257_v31 }
 0x3c1   :  { %2869 = vmatmul.mubr.msk.f32.gmra.mrb[4].mxu1 %vm2276_vm15, %v2258_v47  ;;  %v1726_v36 = vpop.permute.xlu0 %1725 }
 0x3c2   :  { %v1850_v7 = vpop.permute.xlu1 %1849 }
 0x3c3   :  { %v2192_v44 = vsel %vm1067_vm9, %v2176_v62, %v1850_v7 }
 0x3c4   :  { %v2209_v0 = vsel %vm2199_vm11, %v2192_v44, %v1914_v13  ;;  %v2146_v13 = vsel %vm234_vm0, %v4037_v59, %v4250_v29 }
 0x3c5   :  { %v1978_v21 = vpop.permute.xlu0 %1977  ;;  %v2162_v31 = vsel %vm999_vm5, %v2146_v13, %v1726_v36 }
 0x3c6   :  { %v1724_v32 = vpop.permute.xlu1 %1723  ;;  %v2226_v33 = vsel %vm2216_vm12, %v2209_v0, %v1978_v21 }
 0x3c7   :  { %v2161_v18 = vsel %vm999_vm5, %v2145_v50, %v1724_v32 }
 0x3c9   :  { %v1790_v41 = vpop.permute.xlu0 %1789 }
 0x3ca   :  { %v1976_v28 = vpop.permute.xlu1 %1975  ;;  %v2178_v7 = vsel %vm1033_vm7, %v2162_v31, %v1790_v41 }
 0x3cb   :  { %v2225_v51 = vsel %vm2216_vm12, %v2208_v42, %v1976_v28 }
 0x3cd   :  { %v2042_v48 = vpop.permute.xlu0 %2041 }
 0x3ce   :  { %v1788_v9 = vpop.permute.xlu1 %1787  ;;  %v2243_v55 = vsel %vm2233_vm13, %v2226_v33, %v2042_v48 }
 0x3cf   :  { %v2177_v23 = vsel %vm1033_vm7, %v2161_v18, %v1788_v9 }
 0x3d1   :  { %v4265_v38 = vpop.permute.xlu0 %1663 }
 0x3d2   :  { %v2040_v24 = vpop.permute.xlu1 %2039 }
 0x3d3   :  { %v2242_v17 = vsel %vm2233_vm13, %v2225_v51, %v2040_v24 }
 0x3d5   :  { %v1916_v26 = vpop.permute.xlu0 %1915 }
 0x3d6   :  { %v1852_v34 = vpop.permute.xlu1 %1851 }
 0x3d7   :  { %v2193_v56 = vsel %vm1067_vm9, %v2177_v23, %v1852_v34 }
 0x3d8   :  { %v2210_v27 = vsel %vm2199_vm11, %v2193_v56, %v1916_v26  ;;  %v2147_v26 = vsel %vm234_vm0, %v4046_v10, %v4265_v38 }
 0x3d9   :  { %v1666_v45 = vpop.permute.xlu0 %1665 }
 0x3da   :  { %v2104_v30 = vpop.permute.xlu1 %2103  ;;  %v2148_v51 = vsel %vm234_vm0, %v4098_v1, %v1666_v45 }
 0x3db   :  { %v2259_v25 = vsel %vm2250_vm14, %v2242_v17, %v2104_v30 }
 0x3dc   :  { %2871 = vmatprep.mubr.msk.f32.mxu1 %vm2276_vm15, %v2259_v25 }
 0x3dd   :  { %v1918_v60 = vpop.permute.xlu0 %1917 }
 0x3de   :  { %v1854_v61 = vpop.permute.xlu1 %1853 }
 0x3df   :  { %v2194_v21 = vsel %vm1067_vm9, %v2178_v7, %v1854_v61 }
 0x3e0   :  { %v2211_v48 = vsel %vm2199_vm11, %v2194_v21, %v1918_v60 }
 0x3e1   :  { %v1730_v46 = vpop.permute.xlu0 %1729 }
 0x3e2   :  { %v2106_v15 = vpop.permute.xlu1 %2105  ;;  %v2164_v17 = vsel %vm999_vm5, %v2148_v51, %v1730_v46 }
 0x3e3   :  { %v2260_v53 = vsel %vm2250_vm14, %v2243_v55, %v2106_v15 }
 0x3e4   :  { %2872 = vmatmul.mubr.msk.f32.gmra.mrb[6].mxu1 %vm2276_vm15, %v2260_v53 }
 0x3e5   :  { %v1982_v22 = vpop.permute.xlu0 %1981 }
 0x3e6   :  { %v1728_v8 = vpop.permute.xlu1 %1727  ;;  %v2228_v59 = vsel %vm2216_vm12, %v2211_v48, %v1982_v22 }
 0x3e7   :  { %v2163_v6 = vsel %vm999_vm5, %v2147_v26, %v1728_v8 }
 0x3e9   :  { %v1794_v12 = vpop.permute.xlu0 %1793 }
 0x3ea   :  { %v1980_v20 = vpop.permute.xlu1 %1979  ;;  %v2180_v19 = vsel %vm1033_vm7, %v2164_v17, %v1794_v12 }
 0x3eb   :  { %v2227_v52 = vsel %vm2216_vm12, %v2210_v27, %v1980_v20 }
 0x3ed   :  { %v2046_v43 = vpop.permute.xlu0 %2045 }
 0x3ee   :  { %v1792_v49 = vpop.permute.xlu1 %1791  ;;  %v2245_v29 = vsel %vm2233_vm13, %v2228_v59, %v2046_v43 }
 0x3ef   :  { %v2179_v30 = vsel %vm1033_vm7, %v2163_v6, %v1792_v49 }
 0x3f1   :  { %v1668_v35 = vpop.permute.xlu0 %1667 }
 0x3f2   :  { %v2044_v16 = vpop.permute.xlu1 %2043  ;;  %v2149_v55 = vsel %vm234_vm0, %v4111_v39, %v1668_v35 }
 0x3f3   :  { %v2244_v57 = vsel %vm2233_vm13, %v2227_v52, %v2044_v16 }
 0x3f5   :  { %v1920_v3 = vpop.permute.xlu0 %1919 }
 0x3f6   :  { %v1856_v58 = vpop.permute.xlu1 %1855 }
 0x3f7   :  { %v2195_v25 = vsel %vm1067_vm9, %v2179_v30, %v1856_v58 }
 0x3f8   :  { %v2212_v10 = vsel %vm2199_vm11, %v2195_v25, %v1920_v3 }
 0x3f9   :  { %v1670_v14 = vpop.permute.xlu0 %1669 }
 0x3fa   :  { %v2108_v2 = vpop.permute.xlu1 %2107  ;;  %v2150_v56 = vsel %vm234_vm0, %v4174_v5, %v1670_v14 }
 0x3fb   :  { %v2261_v47 = vsel %vm2250_vm14, %v2244_v57, %v2108_v2 }
 0x3fc   :  { %2874 = vmatprep.mubr.msk.f32.mxu1 %vm2276_vm15, %v2261_v47 }
 0x3fd   :  { %v1922_v32 = vpop.permute.xlu0 %1921 }
 0x3fe   :  { %v1858_v28 = vpop.permute.xlu1 %1857 }
 0x3ff   :  { %v2196_v62 = vsel %vm1067_vm9, %v2180_v19, %v1858_v28 }
 0x400   :  { %v2213_v38 = vsel %vm2199_vm11, %v2196_v62, %v1922_v32 }
 0x401   :  { %v1734_v9 = vpop.permute.xlu0 %1733 }
 0x402   :  { %v2110_v40 = vpop.permute.xlu1 %2109  ;;  %v2166_v3 = vsel %vm999_vm5, %v2150_v56, %v1734_v9 }
 0x403   :  { %v2262_v36 = vsel %vm2250_vm14, %v2245_v29, %v2110_v40 }
 0x404   :  { %2875 = vmatmul.mubr.msk.f32.gmra.mrb[8].mxu1 %vm2276_vm15, %v2262_v36 }
 0x405   :  { %v1986_v54 = vpop.permute.xlu0 %1985 }
 0x406   :  { %v1732_v41 = vpop.permute.xlu1 %1731  ;;  %v2230_v45 = vsel %vm2216_vm12, %v2213_v38, %v1986_v54 }
 0x407   :  { %v2165_v53 = vsel %vm999_vm5, %v2149_v55, %v1732_v41 }
 0x409   :  { %v1798_v24 = vpop.permute.xlu0 %1797 }
 0x40a   :  { %v1984_v63 = vpop.permute.xlu1 %1983  ;;  %v2182_v58 = vsel %vm1033_vm7, %v2166_v3, %v1798_v24 }
 0x40b   :  { %v2229_v1 = vsel %vm2216_vm12, %v2212_v10, %v1984_v63 }
 0x40d   :  { %v2050_v4 = vpop.permute.xlu0 %2049 }
 0x40e   :  { %v1796_v37 = vpop.permute.xlu1 %1795  ;;  %v2247_v46 = vsel %vm2233_vm13, %v2230_v45, %v2050_v4 }
 0x40f   :  { %v2181_v8 = vsel %vm1033_vm7, %v2165_v53, %v1796_v37 }
 0x411   :  { %v1862_v34 = vpop.permute.xlu0 %1861 }
 0x412   :  { %v2048_v42 = vpop.permute.xlu1 %2047  ;;  %v2198_v52 = vsel %vm1067_vm9, %v2182_v58, %v1862_v34 }
 0x413   :  { %v2246_v61 = vsel %vm2233_vm13, %v2229_v1, %v2048_v42 }
 0x415   :  { %v2114_v44 = vpop.permute.xlu0 %2113 }
 0x416   :  { %v1860_v60 = vpop.permute.xlu1 %1859  ;;  %v2264_v22 = vsel %vm2250_vm14, %v2247_v46, %v2114_v44 }
 0x417   :  { %v2197_v12 = vsel %vm1067_vm9, %v2181_v8, %v1860_v60 }
 0x419   :  { %v1988_v0 = vpop.permute.xlu0 %1987 }
 0x41a   :  { %v2112_v33 = vpop.permute.xlu1 %2111 }
 0x41b   :  { %v2263_v15 = vsel %vm2250_vm14, %v2246_v61, %v2112_v33 }
 0x41c   :  { %2877 = vmatprep.mubr.msk.f32.mxu1 %vm2276_vm15, %v2263_v15 }
 0x41d   :  { %2878 = vmatmul.mubr.msk.f32.gmra.mrb[10].mxu1 %vm2276_vm15, %v2264_v22  ;;  %v2052_v20 = vpop.permute.xlu0 %2051 }
 0x41e   :  { %v1924_v43 = vpop.permute.xlu1 %1923 }
 0x41f   :  { %v2214_v39 = vsel %vm2199_vm11, %v2197_v12, %v1924_v43 }
 0x420   :  { %v2231_v49 = vsel %vm2216_vm12, %v2214_v39, %v1988_v0 }
 0x421   :  { %v2248_v50 = vsel %vm2233_vm13, %v2231_v49, %v2052_v20  ;;  %v2116_v35 = vpop.permute.xlu0 %2115 }
 0x422   :  { %v1926_v16 = vpop.permute.xlu1 %1925  ;;  %v2265_v18 = vsel %vm2250_vm14, %v2248_v50, %v2116_v35 }
 0x423   :  { %2880 = vmatprep.mubr.msk.f32.mxu1 %vm2276_vm15, %v2265_v18  ;;  %v2215_v13 = vsel %vm2199_vm11, %v2198_v52, %v1926_v16 }
 0x426   :  { %v1990_v23 = vpop.permute.xlu1 %1989 }
 0x427   :  { %v2232_v57 = vsel %vm2216_vm12, %v2215_v13, %v1990_v23 }
 0x42a   :  { %v2054_v27 = vpop.permute.xlu1 %2053 }
 0x42b   :  { %v2249_v2 = vsel %vm2233_vm13, %v2232_v57, %v2054_v27 }
 0x42e   :  { %v2118_v31 = vpop.permute.xlu1 %2117 }
 0x42f   :  { %v2266_v47 = vsel %vm2250_vm14, %v2249_v2, %v2118_v31 }
 0x430   :  { %2881 = vmatmul.mubr.msk.f32.gmra.mrb[12].mxu1 %vm2276_vm15, %v2266_v47 }
 0x44f   :  { %v4352_v7 = vpop.f32.mrb[16].mxu0 }
 0x450   :  { %v2471_v5 = vsel %vm234_vm0, %v4352_v7, 0.0  ;;  %v4356_v14 = vpop.f32.mrb[17].mxu0 }
 0x451   :  { %v2470_v21 = vsel %vm234_vm0, %v4356_v14, 0.0 }
 0x452   :  { %v2472_v32 = vadd.f32 %v2471_v5, %v2470_v21 }
 0x45f   :  { %v4360_v28 = vpop.f32.mrb[0].mxu1 }
 0x460   :  { %v4362_v48 = vpop.f32.mrb[1].mxu1  ;;  %v2475_v9 = vsel %vm234_vm0, %v4360_v28, 0.0 }
 0x461   :  { %v2473_v59 = vsel %vm234_vm0, %v4362_v48, 0.0 }
 0x462   :  { %v2474_v29 = vadd.f32 %v2473_v59, %v2472_v32 }
 0x464   :  { %v2476_v40 = vadd.f32 %v2475_v9, %v2474_v29 }
 0x47f   :  { %v4368_v36 = vpop.f32.mrb[2].mxu1 }
 0x480   :  { %v4370_v54 = vpop.f32.mrb[3].mxu1  ;;  %v2479_v63 = vsel %vm234_vm0, %v4368_v36, 0.0 }
 0x481   :  { %v2477_v41 = vsel %vm234_vm0, %v4370_v54, 0.0 }
 0x482   :  { %v2478_v24 = vadd.f32 %v2477_v41, %v2476_v40 }
 0x484   :  { %v2480_v4 = vadd.f32 %v2479_v63, %v2478_v24 }
 0x494   :  { %v4376_v37 = vpop.f32.mrb[4].mxu1 }
 0x495   :  { %v4378_v26 = vpop.f32.mrb[5].mxu1  ;;  %v2483_v51 = vsel %vm234_vm0, %v4376_v37, 0.0 }
 0x496   :  { %v2481_v34 = vsel %vm234_vm0, %v4378_v26, 0.0 }
 0x497   :  { %v2482_v42 = vadd.f32 %v2481_v34, %v2480_v4 }
 0x499   :  { %v2484_v6 = vadd.f32 %v2483_v51, %v2482_v42 }
 0x4b7   :  { %v4384_v17 = vpop.f32.mrb[6].mxu1 }
 0x4b8   :  { %v4386_v30 = vpop.f32.mrb[7].mxu1  ;;  %v2487_v62 = vsel %vm234_vm0, %v4384_v17, 0.0 }
 0x4b9   :  { %v2485_v19 = vsel %vm234_vm0, %v4386_v30, 0.0 }
 0x4ba   :  { %v2486_v25 = vadd.f32 %v2485_v19, %v2484_v6 }
 0x4bc   :  { %v2488_v44 = vadd.f32 %v2487_v62, %v2486_v25 }
 0x4d7   :  { %v4392_v60 = vpop.f32.mrb[8].mxu1 }
 0x4d8   :  { %v4394_v10 = vpop.f32.mrb[9].mxu1  ;;  %v2491_v45 = vsel %vm234_vm0, %v4392_v60, 0.0 }
 0x4d9   :  { %v2489_v38 = vsel %vm234_vm0, %v4394_v10, 0.0 }
 0x4da   :  { %v2490_v1 = vadd.f32 %v2489_v38, %v2488_v44 }
 0x4dc   :  { %v2492_v61 = vadd.f32 %v2491_v45, %v2490_v1 }
 0x4f0   :  { %v4400_v0 = vpop.f32.mrb[10].mxu1 }
 0x4f1   :  { %v4402_v33 = vpop.f32.mrb[11].mxu1  ;;  %v2495_v15 = vsel %vm234_vm0, %v4400_v0, 0.0 }
 0x4f2   :  { %v2493_v55 = vsel %vm234_vm0, %v4402_v33, 0.0 }
 0x4f3   :  { %v2494_v46 = vadd.f32 %v2493_v55, %v2492_v61 }
 0x4f5   :  { %v2496_v53 = vadd.f32 %v2495_v15, %v2494_v46 }
 0x503   :  { %v4408_v22 = vpop.f32.mrb[12].mxu1 }
 0x504   :  { %v4410_v8 = vpop.f32.mrb[13].mxu1  ;;  %v2499_v43 = vsel %vm234_vm0, %v4408_v22, 0.0 }
 0x505   :  { %v2497_v12 = vsel %vm234_vm0, %v4410_v8, 0.0 }
 0x506   :  { %v2498_v20 = vadd.f32 %v2497_v12, %v2496_v53 }
 0x508   :  { %v2500_v39 = vadd.f32 %v2499_v43, %v2498_v20 }
 0x50a   :  { %v2501_v49 = vrot.slane %v2500_v39, 4 }
 0x50c   :  { %v2502_v50 = vadd.f32 %v2501_v49, %v2500_v39 }
 0x50e   :  { %v2503_v35 = vrot.slane %v2502_v50, 2 }
 0x510   :  { %v2504_v16 = vadd.f32 %v2503_v35, %v2502_v50 }
 0x512   :  { %v2505_v18 = vrot.slane %v2504_v16, 1 }
 0x514   :  { %v2506_v23 = vadd.f32 %v2505_v18, %v2504_v16 }
 0x516   :  { %v4416_v56 = vmul.f32 0.0078125, %v2506_v23 }
 0x518   :  { %v2508_v3 = vsub.f32 %v4356_v14, %v4416_v56  ;;  %v2509_v58 = vsub.f32 %v4352_v7, %v4416_v56  ;;  %v2510_v27 = vsub.f32 %v4362_v48, %v4416_v56  ;;  %v2511_v52 = vsub.f32 %v4360_v28, %v4416_v56 }
 0x519   :  { %v2512_v13 = vsub.f32 %v4370_v54, %v4416_v56  ;;  %v2513_v57 = vsub.f32 %v4368_v36, %v4416_v56  ;;  %v2514_v2 = vsub.f32 %v4378_v26, %v4416_v56  ;;  %v2515_v31 = vsub.f32 %v4376_v37, %v4416_v56 }
 0x51a   :  { %v2516_v47 = vsub.f32 %v4386_v30, %v4416_v56  ;;  %v2517_v5 = vsub.f32 %v4384_v17, %v4416_v56  ;;  %v2518_v21 = vsub.f32 %v4394_v10, %v4416_v56  ;;  %v2519_v32 = vsub.f32 %v4392_v60, %v4416_v56 }
 0x51b   :  { %v2520_v59 = vsub.f32 %v4402_v33, %v4416_v56  ;;  %v2521_v29 = vsub.f32 %v4400_v0, %v4416_v56  ;;  %v2522_v9 = vsub.f32 %v4410_v8, %v4416_v56  ;;  %v2523_v40 = vsub.f32 %v4408_v22, %v4416_v56 }
 0x51c   :  { %v2524_v41 = vmul.f32 %v2508_v3, %v2508_v3  ;;  %v2525_v24 = vmul.f32 %v2509_v58, %v2509_v58  ;;  %v2526_v63 = vmul.f32 %v2510_v27, %v2510_v27  ;;  %v2527_v4 = vmul.f32 %v2511_v52, %v2511_v52 }
 0x51d   :  { %v2528_v6 = vmul.f32 %v2512_v13, %v2512_v13  ;;  %v2529_v62 = vmul.f32 %v2513_v57, %v2513_v57  ;;  %v2530_v1 = vmul.f32 %v2514_v2, %v2514_v2  ;;  %v2531_v55 = vmul.f32 %v2515_v31, %v2515_v31 }
 0x51e   :  { %v2540_v34 = vsel %vm234_vm0, %v2524_v41, 0.0  ;;  %v2541_v42 = vsel %vm234_vm0, %v2525_v24, 0.0  ;;  %v2543_v19 = vsel %vm234_vm0, %v2526_v63, 0.0  ;;  %v2545_v44 = vsel %vm234_vm0, %v2527_v4, 0.0 }
 0x51f   :  { %v2542_v51 = vadd.f32 %v2541_v42, %v2540_v34  ;;  %v2547_v45 = vsel %vm234_vm0, %v2528_v6, 0.0  ;;  %v2549_v46 = vsel %vm234_vm0, %v2529_v62, 0.0  ;;  %v2532_v53 = vmul.f32 %v2516_v47, %v2516_v47 }
 0x520   :  { %v2551_v12 = vsel %vm234_vm0, %v2530_v1, 0.0  ;;  %v2533_v43 = vmul.f32 %v2517_v5, %v2517_v5  ;;  %v2553_v39 = vsel %vm234_vm0, %v2531_v55, 0.0  ;;  %v2534_v50 = vmul.f32 %v2518_v21, %v2518_v21 }
 0x521   :  { %v2544_v25 = vadd.f32 %v2543_v19, %v2542_v51  ;;  %v2555_v35 = vsel %vm234_vm0, %v2532_v53, 0.0  ;;  %v2535_v18 = vmul.f32 %v2519_v32, %v2519_v32  ;;  %v2536_v58 = vmul.f32 %v2520_v59, %v2520_v59 }
 0x522   :  { %v2557_v23 = vsel %vm234_vm0, %v2533_v43, 0.0  ;;  %v2559_v27 = vsel %vm234_vm0, %v2534_v50, 0.0  ;;  %v2537_v13 = vmul.f32 %v2521_v29, %v2521_v29  ;;  %v2538_v31 = vmul.f32 %v2522_v9, %v2522_v9 }
 0x523   :  { %v2546_v38 = vadd.f32 %v2545_v44, %v2544_v25  ;;  %v2561_v57 = vsel %vm234_vm0, %v2535_v18, 0.0  ;;  %v2563_v47 = vsel %vm234_vm0, %v2536_v58, 0.0  ;;  %v2539_v21 = vmul.f32 %v2523_v40, %v2523_v40  ;;  %v2578_v40 = vld [vmem:[%s4560_s5] sm:$0x1] }
 0x524   :  { %v2565_v41 = vsel %vm234_vm0, %v2537_v13, 0.0  ;;  %v2567_v32 = vsel %vm234_vm0, %v2538_v31, 0.0 }
 0x525   :  { %v2548_v61 = vadd.f32 %v2547_v45, %v2546_v38  ;;  %v2569_v59 = vsel %vm234_vm0, %v2539_v21, 0.0  ;;  %v2582_v38 = vld [vmem:[%s4561_s6] sm:$0x1] }
 0x527   :  { %v2550_v15 = vadd.f32 %v2549_v46, %v2548_v61 }
 0x529   :  { %v2552_v20 = vadd.f32 %v2551_v12, %v2550_v15 }
 0x52b   :  { %v2554_v49 = vadd.f32 %v2553_v39, %v2552_v20 }
 0x52d   :  { %v2556_v16 = vadd.f32 %v2555_v35, %v2554_v49 }
 0x52f   :  { %v2558_v3 = vadd.f32 %v2557_v23, %v2556_v16 }
 0x531   :  { %v2560_v52 = vadd.f32 %v2559_v27, %v2558_v3 }
 0x533   :  { %v2562_v2 = vadd.f32 %v2561_v57, %v2560_v52 }
 0x535   :  { %v2564_v5 = vadd.f32 %v2563_v47, %v2562_v2 }
 0x537   :  { %v2566_v24 = vadd.f32 %v2565_v41, %v2564_v5 }
 0x539   :  { %v2568_v63 = vadd.f32 %v2567_v32, %v2566_v24 }
 0x53b   :  { %v2570_v4 = vadd.f32 %v2569_v59, %v2568_v63 }
 0x53d   :  { %v2571_v34 = vrot.slane %v2570_v4, 4 }
 0x53f   :  { %v2572_v42 = vadd.f32 %v2571_v34, %v2570_v4 }
 0x541   :  { %v2573_v29 = vrot.slane %v2572_v42, 2 }
 0x543   :  { %v2574_v51 = vadd.f32 %v2573_v29, %v2572_v42 }
 0x545   :  { %v2575_v6 = vrot.slane %v2574_v51, 1 }
 0x547   :  { %v2576_v19 = vadd.f32 %v2575_v6, %v2574_v51 }
 0x549   :  { %v2577_v9 = vmul.f32 0.0078125, %v2576_v19 }
 0x54b   :  { %v2579_v25 = vadd.f32 1e-05, %v2577_v9 }
 0x54d   :  { %2932 = vrsqrt.f32 %v2579_v25 }
 0x557   :  { %v2933_v62 = vpop.eup %2932 }
 0x558   :  { %v2581_v44 = vmul.f32 %v2933_v62, %v2578_v40 }
 0x55a   :  { %v2583_v1 = vmul.f32 %v2581_v44, %v4416_v56  ;;  %v2589_v45 = vrot.slane %v2581_v44, %v3821_v11 }
 0x55c   :  { %v2584_v61 = vsub.f32 %v2582_v38, %v2583_v1  ;;  %v2591_v55 = vmul.f32 %v2589_v45, %v4356_v14  ;;  %v2592_v46 = vmul.f32 %v4352_v7, %v2589_v45  ;;  %v2593_v15 = vmul.f32 %v2589_v45, %v4362_v48 }
 0x55d   :  { %v2594_v53 = vmul.f32 %v4360_v28, %v2589_v45  ;;  %v2595_v12 = vmul.f32 %v2589_v45, %v4370_v54  ;;  %v2596_v20 = vmul.f32 %v4368_v36, %v2589_v45  ;;  %v2597_v43 = vmul.f32 %v2589_v45, %v4378_v26 }
 0x55e   :  { %v2598_v39 = vmul.f32 %v4376_v37, %v2589_v45  ;;  %v2599_v56 = vmul.f32 %v2589_v45, %v4386_v30  ;;  %v2600_v49 = vmul.f32 %v4384_v17, %v2589_v45  ;;  %v2601_v14 = vmul.f32 %v2589_v45, %v4394_v10 }
 0x55f   :  { %v2602_v7 = vmul.f32 %v4392_v60, %v2589_v45  ;;  %v2603_v48 = vmul.f32 %v2589_v45, %v4402_v33  ;;  %v2604_v28 = vmul.f32 %v4400_v0, %v2589_v45  ;;  %v2605_v54 = vmul.f32 %v2589_v45, %v4410_v8 }
 0x560   :  { %v2606_v36 = vmul.f32 %v4408_v22, %v2589_v45  ;;  %v2611_v26 = vrot.slane %v2584_v61, %v3821_v11 }
 0x562   :  { %v2613_v50 = vadd.f32 %v2611_v26, %v2591_v55  ;;  %v2614_v37 = vadd.f32 %v2611_v26, %v2592_v46  ;;  %v2615_v35 = vadd.f32 %v2611_v26, %v2593_v15  ;;  %v2616_v30 = vadd.f32 %v2611_v26, %v2594_v53 }
 0x563   :  { %v2617_v16 = vadd.f32 %v2611_v26, %v2595_v12  ;;  %v2618_v17 = vadd.f32 %v2611_v26, %v2596_v20  ;;  %v2619_v18 = vadd.f32 %v2611_v26, %v2597_v43  ;;  %v2620_v10 = vadd.f32 %v2611_v26, %v2598_v39 }
 0x564   :  { %v2621_v23 = vadd.f32 %v2611_v26, %v2599_v56  ;;  %v2622_v60 = vadd.f32 %v2611_v26, %v2600_v49  ;;  %v2623_v3 = vadd.f32 %v2611_v26, %v2601_v14  ;;  %v2624_v33 = vadd.f32 %v2611_v26, %v2602_v7 }
 0x565   :  { %v2625_v58 = vadd.f32 %v2611_v26, %v2603_v48  ;;  %v2626_v0 = vadd.f32 %v2611_v26, %v2604_v28  ;;  %v2627_v27 = vadd.f32 %v2611_v26, %v2605_v54  ;;  %v2628_v8 = vadd.f32 %v2611_v26, %v2606_v36 }
 0x566   :  { %v2629_v52 = vmax.f32 %v2613_v50, 0.0  ;;  %v2630_v22 = vmax.f32 %v2614_v37, 0.0  ;;  %v2631_v13 = vmax.f32 %v2615_v35, 0.0  ;;  %v2632_v11 = vmax.f32 %v2616_v30, 0.0 }
 0x567   :  { %v2633_v57 = vmax.f32 %v2617_v16, 0.0  ;;  %v2634_v2 = vmax.f32 %v2618_v17, 0.0  ;;  %v2635_v31 = vmax.f32 %v2619_v18, 0.0  ;;  %v2636_v47 = vmax.f32 %v2620_v10, 0.0 }
 0x568   :  { %v2637_v5 = vmax.f32 %v2621_v23, 0.0  ;;  %v2638_v21 = vmax.f32 %v2622_v60, 0.0  ;;  %v2639_v41 = vmax.f32 %v2623_v3, 0.0  ;;  %v2640_v24 = vmax.f32 %v2624_v33, 0.0  ;;  %2645 = vst.msk [vmem:[%s4562_s7] sm:$0xff] %vm234_vm0, %v2629_v52  ;;  %2646 = vst.msk [vmem:[%s4562_s7 + $0x8] sm:$0xff] %vm234_vm0, %v2630_v22 }
 0x569   :  { %2647 = vst.msk [vmem:[%s4562_s7 + $0x10] sm:$0xff] %vm234_vm0, %v2631_v13  ;;  %2648 = vst.msk [vmem:[%s4562_s7 + $0x18] sm:$0xff] %vm234_vm0, %v2632_v11  ;;  %v2641_v32 = vmax.f32 %v2625_v58, 0.0  ;;  %v2642_v63 = vmax.f32 %v2626_v0, 0.0  ;;  %v2643_v59 = vmax.f32 %v2627_v27, 0.0  ;;  %v2644_v4 = vmax.f32 %v2628_v8, 0.0 }
 0x56a   :  { %2649 = vst.msk [vmem:[%s4562_s7 + $0x20] sm:$0xff] %vm234_vm0, %v2633_v57  ;;  %2650 = vst.msk [vmem:[%s4562_s7 + $0x28] sm:$0xff] %vm234_vm0, %v2634_v2 }
 0x56b   :  { %2651 = vst.msk [vmem:[%s4562_s7 + $0x30] sm:$0xff] %vm234_vm0, %v2635_v31  ;;  %2652 = vst.msk [vmem:[%s4562_s7 + $0x38] sm:$0xff] %vm234_vm0, %v2636_v47 }
 0x56c   :  { %2653 = vst.msk [vmem:[%s4562_s7 + $0x40] sm:$0xff] %vm234_vm0, %v2637_v5  ;;  %2654 = vst.msk [vmem:[%s4562_s7 + $0x48] sm:$0xff] %vm234_vm0, %v2638_v21 }
 0x56d   :  { %2655 = vst.msk [vmem:[%s4562_s7 + $0x50] sm:$0xff] %vm234_vm0, %v2639_v41  ;;  %2656 = vst.msk [vmem:[%s4562_s7 + $0x58] sm:$0xff] %vm234_vm0, %v2640_v24 }
 0x56e   :  { %2657 = vst.msk [vmem:[%s4562_s7 + $0x60] sm:$0xff] %vm234_vm0, %v2641_v32  ;;  %2658 = vst.msk [vmem:[%s4562_s7 + $0x68] sm:$0xff] %vm234_vm0, %v2642_v63 }
 0x56f   :  { %2659 = vst.msk [vmem:[%s4562_s7 + $0x70] sm:$0xff] %vm234_vm0, %v2643_v59  ;;  %2660 = vst.msk [vmem:[%s4562_s7 + $0x78] sm:$0xff] %vm234_vm0, %v2644_v4 }

</bundles_post_ra>
